<compile_context>
chip_gen: v6e
topology: v6e:2x2x1
jax: 0.10.0
libtpu: 0.0.40
codegen_flags: <defaults>
</compile_context>

<pallas_src>
import jax
import jax.numpy as jnp
from jax.experimental import pallas as pl
from jax.experimental.pallas import tpu as pltpu

# ----------------------------- configuration ---------------------------------
UTT_EMB_DIM = 12        # utt_emb feature size
SEQ_EMB_DIM = 32        # seq_emb feature size
ROLE_EMB_SIZE = 3
N_UTT = 8               # utterances per conference
HIDDEN = 128            # ConferenceEncoder.hidden_size
BN_EPS = 1e-5
OUT_PAD = 128           # lane-dense padded output width (sliced to 1 in the wrapper)
TILE_B_MAX = 512        # per-grid-step batch tile (safe for v7x's 64 MiB VMEM)

PROJ_IN = ROLE_EMB_SIZE + UTT_EMB_DIM + 1          # linear_proj input dim = 16
FC1_IN = SEQ_EMB_DIM + HIDDEN                      # fc1 input dim = 160


def _round_up(x, m):
    return (x + m - 1) // m * m


# ----------------------------- fused Pallas kernel ----------------------------
def _fused_kernel(seq_ref, pooled_ref,
                  wc_ref, bc_ref,
                  w1s_ref, w1c_ref, b1_ref,
                  w2_ref, b2_ref,
                  w3_ref, b3_ref,
                  w4_ref, b4_ref,
                  out_ref):
    """Conference encoder (composed) + fc1..fc4 head, one batch tile per grid step.

    seq_ref    : (TB, SEQ_EMB_DIM)  f32
    pooled_ref : (TB, PROJ_IN)      f32   mean over utterances of [utt | role_emb | part]
    wc_ref     : (PROJ_IN, HIDDEN)  bf16  composed w_proj @ w_enc
    w1s/w1c    : fc1 split into the seq (32,1024) and conference (128,1024) halves, bf16
    w2/w3/w4   : fc2/fc3/fc4 with the preceding inference-BatchNorm folded in, bf16
    biases     : f32 row vectors
    out_ref    : (TB, OUT_PAD)      f32   (only column 0 is meaningful)
    """
    seq = seq_ref[...]          # f32
    pooled = pooled_ref[...]    # f32

    # conference embedding: relu(mean(u) @ (w_proj @ w_enc) + (b_proj @ w_enc + b_enc))
    conf = jnp.dot(pooled.astype(jnp.bfloat16), wc_ref[...],
                   preferred_element_type=jnp.float32) + bc_ref[...]
    conf = jnp.maximum(conf, 0.0)

    # fc1 (concat done implicitly by splitting the weight) -> dropout(id) -> relu
    h = (jnp.dot(seq.astype(jnp.bfloat16), w1s_ref[...],
                 preferred_element_type=jnp.float32)
         + jnp.dot(conf.astype(jnp.bfloat16), w1c_ref[...],
                   preferred_element_type=jnp.float32)
         + b1_ref[...])
    h = jnp.maximum(h, 0.0)

    # bn1 folded into fc2 -> dropout(id) -> relu
    h = jnp.dot(h.astype(jnp.bfloat16), w2_ref[...],
                preferred_element_type=jnp.float32) + b2_ref[...]
    h = jnp.maximum(h, 0.0)

    # bn2 folded into fc3 -> dropout(id) -> relu
    h = jnp.dot(h.astype(jnp.bfloat16), w3_ref[...],
                preferred_element_type=jnp.float32) + b3_ref[...]
    h = jnp.maximum(h, 0.0)

    # bn3 folded into fc4; output padded to 128 lanes for an unmasked dense store
    out_ref[...] = (jnp.dot(h.astype(jnp.bfloat16), w4_ref[...],
                            preferred_element_type=jnp.float32) + b4_ref[...])


# ----------------------------- parameter init --------------------------------
def _linear_params(key, fan_in, fan_out):
    kw, kb = jax.random.split(key)
    bound = 1.0 / jnp.sqrt(jnp.float32(fan_in))
    w = jax.random.uniform(kw, (fan_in, fan_out), jnp.float32, -bound, bound)
    b = jax.random.uniform(kb, (1, fan_out), jnp.float32, -bound, bound)
    return w, b


def _bn_params(key, dim):
    kg, kb, km, kv = jax.random.split(key, 4)
    gamma = 1.0 + 0.05 * jax.random.normal(kg, (1, dim), jnp.float32)
    beta = 0.05 * jax.random.normal(kb, (1, dim), jnp.float32)
    running_mean = 0.05 * jax.random.normal(km, (1, dim), jnp.float32)
    running_var = 1.0 + 0.05 * jnp.abs(jax.random.normal(kv, (1, dim), jnp.float32))
    scale = gamma / jnp.sqrt(running_var + BN_EPS)
    shift = beta - running_mean * scale
    return scale, shift


def init_params(seed=42):
    keys = jax.random.split(jax.random.PRNGKey(seed), 10)
    params = {}
    params["role_table"] = 0.1 * jax.random.normal(keys[0], (3, ROLE_EMB_SIZE), jnp.float32)
    params["w_proj"], params["b_proj"] = _linear_params(keys[1], PROJ_IN, HIDDEN)
    params["w_enc"], params["b_enc"] = _linear_params(keys[2], HIDDEN, HIDDEN)
    params["w1"], params["b1"] = _linear_params(keys[3], FC1_IN, 1024)
    params["w2"], params["b2"] = _linear_params(keys[4], 1024, 512)
    params["w3"], params["b3"] = _linear_params(keys[5], 512, 256)
    params["w4"], params["b4"] = _linear_params(keys[6], 256, 1)
    params["s1"], params["t1"] = _bn_params(keys[7], 1024)
    params["s2"], params["t2"] = _bn_params(keys[8], 512)
    params["s3"], params["t3"] = _bn_params(keys[9], 256)
    return params


def fold_params(p):
    """Compose / constant-fold the raw (PyTorch-style) params into kernel-ready ones.

    Exact algebra (done once in f32), weights then cast to bf16 for the MXU:
      * conference:  Wc = w_proj @ w_enc,  bc = b_proj @ w_enc + b_enc
      * fc1 split into the seq (first 32 rows) and conference (last 128 rows) halves
      * inference BN_k folded into fc_{k+1}: w <- diag(s) @ w,  b <- b + t @ w
      * fc4 output padded to 128 lanes for a dense final store
    """
    wc = p["w_proj"] @ p["w_enc"]
    bc = p["b_proj"] @ p["w_enc"] + p["b_enc"]

    w1s = p["w1"][:SEQ_EMB_DIM]
    w1c = p["w1"][SEQ_EMB_DIM:]
    b1 = p["b1"]

    w2 = p["s1"].T * p["w2"]
    b2 = p["b2"] + p["t1"] @ p["w2"]
    w3 = p["s2"].T * p["w3"]
    b3 = p["b3"] + p["t2"] @ p["w3"]
    w4 = p["s3"].T * p["w4"]
    b4 = p["b4"] + p["t3"] @ p["w4"]

    w4p = jnp.zeros((w4.shape[0], OUT_PAD), jnp.float32).at[:, :1].set(w4)
    b4p = jnp.zeros((1, OUT_PAD), jnp.float32).at[:, :1].set(b4)

    return {
        "role_table": p["role_table"],
        "wc": wc.astype(jnp.bfloat16), "bc": bc,
        "w1s": w1s.astype(jnp.bfloat16), "w1c": w1c.astype(jnp.bfloat16), "b1": b1,
        "w2": w2.astype(jnp.bfloat16), "b2": b2,
        "w3": w3.astype(jnp.bfloat16), "b3": b3,
        "w4": w4p.astype(jnp.bfloat16), "b4": b4p,
    }


# ----------------------------- forward wrapper --------------------------------
@jax.jit
def volatility_regressor_forward(fp, seq_emb, utt_emb, role_tokens, part_tokens):
    B = seq_emb.shape[0]

    # --- glue: embedding gather + concat + mean-pool (cheap, commutes with the
    #     composed affine map) -------------------------------------------------
    role_emb = jnp.take(fp["role_table"], role_tokens, axis=0)               # (B, N, 3)
    utt_full = jnp.concatenate(
        [utt_emb, role_emb, part_tokens[..., None]], axis=-1)                # (B, N, 16)
    pooled = jnp.mean(utt_full.astype(jnp.float32), axis=1)                  # (B, 16)

    # --- pad batch to a multiple of the tile (>= 8 sublanes) -------------------
    tile_b = min(TILE_B_MAX, _round_up(B, 8))
    b_pad = _round_up(B, tile_b)
    seq_p = jnp.zeros((b_pad, SEQ_EMB_DIM), jnp.float32).at[:B].set(seq_emb)
    pooled_p = jnp.zeros((b_pad, PROJ_IN), jnp.float32).at[:B].set(pooled)

    weights = (fp["wc"], fp["bc"],
               fp["w1s"], fp["w1c"], fp["b1"],
               fp["w2"], fp["b2"],
               fp["w3"], fp["b3"],
               fp["w4"], fp["b4"])

    in_specs = (
        [pl.BlockSpec((tile_b, SEQ_EMB_DIM), lambda i: (i, 0)),
         pl.BlockSpec((tile_b, PROJ_IN), lambda i: (i, 0))]
        # constant block index -> each weight is DMA'd to VMEM once and stays resident
        + [pl.BlockSpec(w.shape, lambda i: (0, 0)) for w in weights]
    )

    out_padded = pl.pallas_call(
        _fused_kernel,
        out_shape=jax.ShapeDtypeStruct((b_pad, OUT_PAD), jnp.float32),
        grid=(b_pad // tile_b,),
        in_specs=in_specs,
        out_specs=pl.BlockSpec((tile_b, OUT_PAD), lambda i: (i, 0)),
        compiler_params=pltpu.CompilerParams(
            dimension_semantics=("parallel",)),   # batch tiles shard across v7x's 2 TCs
    )(seq_p, pooled_p, *weights)

    return out_padded[:B, :1]


# ----------------------------- pure-JAX reference -----------------------------
def reference_forward(p, seq_emb, utt_emb, role_tokens, part_tokens):
    """f32 reference that mirrors the PyTorch module op-for-op (inference mode)."""
    role_emb = p["role_table"][role_tokens]                                   # (B, N, 3)
    utt = jnp.concatenate([utt_emb, role_emb, part_tokens[..., None]], -1)    # (B, N, 16)
    utt = utt @ p["w_proj"] + p["b_proj"]                                     # linear_proj
    # ConferenceEncoder (assumed): mean-pool -> Linear(128,128) -> ReLU
    conf = jnp.maximum(jnp.mean(utt, axis=1) @ p["w_enc"] + p["b_enc"], 0.0)
    x = jnp.concatenate([seq_emb, conf], axis=-1)
    h = jnp.maximum(x @ p["w1"] + p["b1"], 0.0)
    h = h * p["s1"] + p["t1"]                                                 # bn1 (eval)
    h = jnp.maximum(h @ p["w2"] + p["b2"], 0.0)
    h = h * p["s2"] + p["t2"]                                                 # bn2 (eval)
    h = jnp.maximum(h @ p["w3"] + p["b3"], 0.0)
    h = h * p["s3"] + p["t3"]                                                 # bn3 (eval)
    return h @ p["w4"] + p["b4"]                                              # (B, 1)


# ----------------------------------- main -------------------------------------
if __name__ == "__main__":
    B = 2
    key = jax.random.PRNGKey(0)
    k_seq, k_utt, k_role, k_part = jax.random.split(key, 4)

    seq_emb = jax.random.normal(k_seq, (B, SEQ_EMB_DIM), jnp.float32)
    utt_emb = jax.random.normal(k_utt, (B, N_UTT, UTT_EMB_DIM), jnp.float32)
    role_tokens = jax.random.randint(k_role, (B, N_UTT), 0, 3, jnp.int32)
    part_tokens = jax.random.bernoulli(k_part, 0.5, (B, N_UTT)).astype(jnp.float32)

    params = init_params(seed=42)
    folded = fold_params(params)

    out = volatility_regressor_forward(folded, seq_emb, utt_emb, role_tokens, part_tokens)
    out = jax.block_until_ready(out)

    assert out.shape == (B, 1), out.shape
    assert jnp.all(jnp.isfinite(out))

    # correctness vs. the op-for-op f32 reference (tolerance covers bf16 weights/acts)
    ref = reference_forward(params, seq_emb, utt_emb, role_tokens, part_tokens)
    tol = 2e-2 * (1.0 + float(jnp.max(jnp.abs(ref))))
    max_err = float(jnp.max(jnp.abs(out - ref)))
    assert max_err < tol, f"max_err={max_err} tol={tol}"

    print("KERNEL_OK")
</pallas_src>

<mosaic_0001>
module attributes {stable_mosaic.version = 11 : i64} {
  func.func @_fused_kernel(%arg0: i32, %arg1: memref<8x32xf32, #tpu.memory_space<vmem>>, %arg2: memref<8x16xf32, #tpu.memory_space<vmem>>, %arg3: memref<16x128xbf16, #tpu.memory_space<vmem>>, %arg4: memref<1x128xf32, #tpu.memory_space<vmem>>, %arg5: memref<32x1024xbf16, #tpu.memory_space<vmem>>, %arg6: memref<128x1024xbf16, #tpu.memory_space<vmem>>, %arg7: memref<1x1024xf32, #tpu.memory_space<vmem>>, %arg8: memref<1024x512xbf16, #tpu.memory_space<vmem>>, %arg9: memref<1x512xf32, #tpu.memory_space<vmem>>, %arg10: memref<512x256xbf16, #tpu.memory_space<vmem>>, %arg11: memref<1x256xf32, #tpu.memory_space<vmem>>, %arg12: memref<256x128xbf16, #tpu.memory_space<vmem>>, %arg13: memref<1x128xf32, #tpu.memory_space<vmem>>, %arg14: memref<8x128xf32, #tpu.memory_space<vmem>>) attributes {dimension_semantics = [#tpu.dimension_semantics<parallel>], iteration_bounds = array<i64: 1>, scalar_prefetch = 0 : i64, scratch_operands = 0 : i64, tpu.core_type = #tpu.core_type<tc>, window_params = [{transform_indices = @transform_0, window_bounds = array<i64: 8, 32>}, {transform_indices = @transform_1, window_bounds = array<i64: 8, 16>}, {pipeline_mode = #tpu.pipeline_mode<synchronous>, transform_indices = @transform_2, window_bounds = array<i64: 16, 128>}, {pipeline_mode = #tpu.pipeline_mode<synchronous>, transform_indices = @transform_3, window_bounds = array<i64: 1, 128>}, {pipeline_mode = #tpu.pipeline_mode<synchronous>, transform_indices = @transform_4, window_bounds = array<i64: 32, 1024>}, {pipeline_mode = #tpu.pipeline_mode<synchronous>, transform_indices = @transform_5, window_bounds = array<i64: 128, 1024>}, {pipeline_mode = #tpu.pipeline_mode<synchronous>, transform_indices = @transform_6, window_bounds = array<i64: 1, 1024>}, {pipeline_mode = #tpu.pipeline_mode<synchronous>, transform_indices = @transform_7, window_bounds = array<i64: 1024, 512>}, {pipeline_mode = #tpu.pipeline_mode<synchronous>, transform_indices = @transform_8, window_bounds = array<i64: 1, 512>}, {pipeline_mode = #tpu.pipeline_mode<synchronous>, transform_indices = @transform_9, window_bounds = array<i64: 512, 256>}, {pipeline_mode = #tpu.pipeline_mode<synchronous>, transform_indices = @transform_10, window_bounds = array<i64: 1, 256>}, {pipeline_mode = #tpu.pipeline_mode<synchronous>, transform_indices = @transform_11, window_bounds = array<i64: 256, 128>}, {pipeline_mode = #tpu.pipeline_mode<synchronous>, transform_indices = @transform_12, window_bounds = array<i64: 1, 128>}, {transform_indices = @transform_13, window_bounds = array<i64: 8, 128>}]} {
    %c0 = arith.constant 0 : index
    %c0_0 = arith.constant 0 : index
    %0 = vector.load %arg1[%c0, %c0_0] : memref<8x32xf32, #tpu.memory_space<vmem>>, vector<8x32xf32>
    %c0_1 = arith.constant 0 : index
    %c0_2 = arith.constant 0 : index
    %1 = vector.load %arg2[%c0_1, %c0_2] : memref<8x16xf32, #tpu.memory_space<vmem>>, vector<8x16xf32>
    %2 = arith.truncf %1 : vector<8x16xf32> to vector<8x16xbf16>
    %c0_3 = arith.constant 0 : index
    %c0_4 = arith.constant 0 : index
    %3 = vector.load %arg3[%c0_3, %c0_4] : memref<16x128xbf16, #tpu.memory_space<vmem>>, vector<16x128xbf16>
    %cst = arith.constant dense<0.000000e+00> : vector<8x128xf32>
    %4 = tpu.matmul %2, %3, %cst {dimension_numbers = #tpu.dot_dimension_numbers<[1], [0], [0], [1], [0, 0, 1, 1], [], []>} : vector<8x16xbf16>, vector<16x128xbf16>, vector<8x128xf32> -> vector<8x128xf32>
    %c0_5 = arith.constant 0 : index
    %c0_6 = arith.constant 0 : index
    %5 = vector.load %arg4[%c0_5, %c0_6] : memref<1x128xf32, #tpu.memory_space<vmem>>, vector<1x128xf32>
    %6 = vector.broadcast %5 : vector<1x128xf32> to vector<8x128xf32>
    %7 = arith.addf %4, %6 : vector<8x128xf32>
    %cst_7 = arith.constant 0.000000e+00 : f32
    %8 = vector.broadcast %cst_7 : f32 to vector<8x128xf32>
    %9 = arith.maximumf %7, %8 : vector<8x128xf32>
    %10 = arith.truncf %0 : vector<8x32xf32> to vector<8x32xbf16>
    %c0_8 = arith.constant 0 : index
    %c0_9 = arith.constant 0 : index
    %11 = vector.load %arg5[%c0_8, %c0_9] : memref<32x1024xbf16, #tpu.memory_space<vmem>>, vector<32x1024xbf16>
    %cst_10 = arith.constant dense<0.000000e+00> : vector<8x1024xf32>
    %12 = tpu.matmul %10, %11, %cst_10 {dimension_numbers = #tpu.dot_dimension_numbers<[1], [0], [0], [1], [0, 0, 1, 1], [], []>} : vector<8x32xbf16>, vector<32x1024xbf16>, vector<8x1024xf32> -> vector<8x1024xf32>
    %13 = arith.truncf %9 : vector<8x128xf32> to vector<8x128xbf16>
    %c0_11 = arith.constant 0 : index
    %c0_12 = arith.constant 0 : index
    %14 = vector.load %arg6[%c0_11, %c0_12] : memref<128x1024xbf16, #tpu.memory_space<vmem>>, vector<128x1024xbf16>
    %cst_13 = arith.constant dense<0.000000e+00> : vector<8x1024xf32>
    %15 = tpu.matmul %13, %14, %cst_13 {dimension_numbers = #tpu.dot_dimension_numbers<[1], [0], [0], [1], [0, 0, 1, 1], [], []>} : vector<8x128xbf16>, vector<128x1024xbf16>, vector<8x1024xf32> -> vector<8x1024xf32>
    %16 = arith.addf %12, %15 : vector<8x1024xf32>
    %c0_14 = arith.constant 0 : index
    %c0_15 = arith.constant 0 : index
    %17 = vector.load %arg7[%c0_14, %c0_15] : memref<1x1024xf32, #tpu.memory_space<vmem>>, vector<1x1024xf32>
    %18 = vector.broadcast %17 : vector<1x1024xf32> to vector<8x1024xf32>
    %19 = arith.addf %16, %18 : vector<8x1024xf32>
    %cst_16 = arith.constant 0.000000e+00 : f32
    %20 = vector.broadcast %cst_16 : f32 to vector<8x1024xf32>
    %21 = arith.maximumf %19, %20 : vector<8x1024xf32>
    %22 = arith.truncf %21 : vector<8x1024xf32> to vector<8x1024xbf16>
    %c0_17 = arith.constant 0 : index
    %c0_18 = arith.constant 0 : index
    %23 = vector.load %arg8[%c0_17, %c0_18] : memref<1024x512xbf16, #tpu.memory_space<vmem>>, vector<1024x512xbf16>
    %cst_19 = arith.constant dense<0.000000e+00> : vector<8x512xf32>
    %24 = tpu.matmul %22, %23, %cst_19 {dimension_numbers = #tpu.dot_dimension_numbers<[1], [0], [0], [1], [0, 0, 1, 1], [], []>} : vector<8x1024xbf16>, vector<1024x512xbf16>, vector<8x512xf32> -> vector<8x512xf32>
    %c0_20 = arith.constant 0 : index
    %c0_21 = arith.constant 0 : index
    %25 = vector.load %arg9[%c0_20, %c0_21] : memref<1x512xf32, #tpu.memory_space<vmem>>, vector<1x512xf32>
    %26 = vector.broadcast %25 : vector<1x512xf32> to vector<8x512xf32>
    %27 = arith.addf %24, %26 : vector<8x512xf32>
    %cst_22 = arith.constant 0.000000e+00 : f32
    %28 = vector.broadcast %cst_22 : f32 to vector<8x512xf32>
    %29 = arith.maximumf %27, %28 : vector<8x512xf32>
    %30 = arith.truncf %29 : vector<8x512xf32> to vector<8x512xbf16>
    %c0_23 = arith.constant 0 : index
    %c0_24 = arith.constant 0 : index
    %31 = vector.load %arg10[%c0_23, %c0_24] : memref<512x256xbf16, #tpu.memory_space<vmem>>, vector<512x256xbf16>
    %cst_25 = arith.constant dense<0.000000e+00> : vector<8x256xf32>
    %32 = tpu.matmul %30, %31, %cst_25 {dimension_numbers = #tpu.dot_dimension_numbers<[1], [0], [0], [1], [0, 0, 1, 1], [], []>} : vector<8x512xbf16>, vector<512x256xbf16>, vector<8x256xf32> -> vector<8x256xf32>
    %c0_26 = arith.constant 0 : index
    %c0_27 = arith.constant 0 : index
    %33 = vector.load %arg11[%c0_26, %c0_27] : memref<1x256xf32, #tpu.memory_space<vmem>>, vector<1x256xf32>
    %34 = vector.broadcast %33 : vector<1x256xf32> to vector<8x256xf32>
    %35 = arith.addf %32, %34 : vector<8x256xf32>
    %cst_28 = arith.constant 0.000000e+00 : f32
    %36 = vector.broadcast %cst_28 : f32 to vector<8x256xf32>
    %37 = arith.maximumf %35, %36 : vector<8x256xf32>
    %38 = arith.truncf %37 : vector<8x256xf32> to vector<8x256xbf16>
    %c0_29 = arith.constant 0 : index
    %c0_30 = arith.constant 0 : index
    %39 = vector.load %arg12[%c0_29, %c0_30] : memref<256x128xbf16, #tpu.memory_space<vmem>>, vector<256x128xbf16>
    %cst_31 = arith.constant dense<0.000000e+00> : vector<8x128xf32>
    %40 = tpu.matmul %38, %39, %cst_31 {dimension_numbers = #tpu.dot_dimension_numbers<[1], [0], [0], [1], [0, 0, 1, 1], [], []>} : vector<8x256xbf16>, vector<256x128xbf16>, vector<8x128xf32> -> vector<8x128xf32>
    %c0_32 = arith.constant 0 : index
    %c0_33 = arith.constant 0 : index
    %41 = vector.load %arg13[%c0_32, %c0_33] : memref<1x128xf32, #tpu.memory_space<vmem>>, vector<1x128xf32>
    %42 = vector.broadcast %41 : vector<1x128xf32> to vector<8x128xf32>
    %43 = arith.addf %40, %42 : vector<8x128xf32>
    %c0_34 = arith.constant 0 : index
    %c0_35 = arith.constant 0 : index
    %44 = vector.load %arg14[%c0_34, %c0_35] : memref<8x128xf32, #tpu.memory_space<vmem>>, vector<8x128xf32>
    tpu.vector_store %arg14[%c0_34, %c0_35], %43 {strides = array<i32>} : memref<8x128xf32, #tpu.memory_space<vmem>>, vector<8x128xf32>,
    return
  }
  func.func @transform_0(%arg0: i32) -> (i32, i32) {
    %c0_i32 = arith.constant 0 : i32
    %c0_i32_0 = arith.constant 0 : i32
    return %arg0, %c0_i32 : i32, i32
  }
  func.func @transform_1(%arg0: i32) -> (i32, i32) {
    %c0_i32 = arith.constant 0 : i32
    %c0_i32_0 = arith.constant 0 : i32
    return %arg0, %c0_i32 : i32, i32
  }
  func.func @transform_2(%arg0: i32) -> (i32, i32) {
    %c0_i32 = arith.constant 0 : i32
    %c0_i32_0 = arith.constant 0 : i32
    %c0_i32_1 = arith.constant 0 : i32
    return %c0_i32, %c0_i32_0 : i32, i32
  }
  func.func @transform_3(%arg0: i32) -> (i32, i32) {
    %c0_i32 = arith.constant 0 : i32
    %c0_i32_0 = arith.constant 0 : i32
    %c0_i32_1 = arith.constant 0 : i32
    return %c0_i32, %c0_i32_0 : i32, i32
  }
  func.func @transform_4(%arg0: i32) -> (i32, i32) {
    %c0_i32 = arith.constant 0 : i32
    %c0_i32_0 = arith.constant 0 : i32
    %c0_i32_1 = arith.constant 0 : i32
    return %c0_i32, %c0_i32_0 : i32, i32
  }
  func.func @transform_5(%arg0: i32) -> (i32, i32) {
    %c0_i32 = arith.constant 0 : i32
    %c0_i32_0 = arith.constant 0 : i32
    %c0_i32_1 = arith.constant 0 : i32
    return %c0_i32, %c0_i32_0 : i32, i32
  }
  func.func @transform_6(%arg0: i32) -> (i32, i32) {
    %c0_i32 = arith.constant 0 : i32
    %c0_i32_0 = arith.constant 0 : i32
    %c0_i32_1 = arith.constant 0 : i32
    return %c0_i32, %c0_i32_0 : i32, i32
  }
  func.func @transform_7(%arg0: i32) -> (i32, i32) {
    %c0_i32 = arith.constant 0 : i32
    %c0_i32_0 = arith.constant 0 : i32
    %c0_i32_1 = arith.constant 0 : i32
    return %c0_i32, %c0_i32_0 : i32, i32
  }
  func.func @transform_8(%arg0: i32) -> (i32, i32) {
    %c0_i32 = arith.constant 0 : i32
    %c0_i32_0 = arith.constant 0 : i32
    %c0_i32_1 = arith.constant 0 : i32
    return %c0_i32, %c0_i32_0 : i32, i32
  }
  func.func @transform_9(%arg0: i32) -> (i32, i32) {
    %c0_i32 = arith.constant 0 : i32
    %c0_i32_0 = arith.constant 0 : i32
    %c0_i32_1 = arith.constant 0 : i32
    return %c0_i32, %c0_i32_0 : i32, i32
  }
  func.func @transform_10(%arg0: i32) -> (i32, i32) {
    %c0_i32 = arith.constant 0 : i32
    %c0_i32_0 = arith.constant 0 : i32
    %c0_i32_1 = arith.constant 0 : i32
    return %c0_i32, %c0_i32_0 : i32, i32
  }
  func.func @transform_11(%arg0: i32) -> (i32, i32) {
    %c0_i32 = arith.constant 0 : i32
    %c0_i32_0 = arith.constant 0 : i32
    %c0_i32_1 = arith.constant 0 : i32
    return %c0_i32, %c0_i32_0 : i32, i32
  }
  func.func @transform_12(%arg0: i32) -> (i32, i32) {
    %c0_i32 = arith.constant 0 : i32
    %c0_i32_0 = arith.constant 0 : i32
    %c0_i32_1 = arith.constant 0 : i32
    return %c0_i32, %c0_i32_0 : i32, i32
  }
  func.func @transform_13(%arg0: i32) -> (i32, i32) {
    %c0_i32 = arith.constant 0 : i32
    %c0_i32_0 = arith.constant 0 : i32
    return %arg0, %c0_i32 : i32, i32
  }
}

</mosaic_0001>

<bundles_post_ra>
// kernel: volatility_regressor_forward.1
= control target key start
LH: loop header
LB: loop body
LE: loop exit
PB: predicated region body
PF: predicated region fallthrough
CT: control target
= control target key end

     0   :  { %18 = vsyncpa [#allocation3], 0  ;;  %s4953_s0 = inlined_call_operand.vmem [shape: f32[8,32], index: 0, kind: input, shape index: {}]   ;;  %s4954_s1 = inlined_call_operand.vmem [shape: f32[8,16], index: 1, kind: input, shape index: {}]   ;;  %s4955_s2 = inlined_call_operand.vmem [shape: bf16[16,128], index: 2, kind: input, shape index: {}]   ;;  %s4956_s3 = inlined_call_operand.vmem [shape: f32[1,128], index: 3, kind: input, shape index: {}]   ;;  %s4957_s4 = inlined_call_operand.vmem [shape: bf16[32,1024], index: 4, kind: input, shape index: {}]   ;;  %s4958_s5 = inlined_call_operand.hbm [shape: bf16[128,1024], index: 5, kind: input, shape index: {}]   ;;  %s4959_s6 = inlined_call_operand.vmem [shape: f32[1,1024], index: 6, kind: input, shape index: {}]   ;;  %s4960_s7 = inlined_call_operand.hbm [shape: bf16[1024,512], index: 7, kind: input, shape index: {}]   ;;  %s4961_s8 = inlined_call_operand.vmem [shape: f32[1,512], index: 8, kind: input, shape index: {}]   ;;  %s4962_s9 = inlined_call_operand.hbm [shape: bf16[512,256], index: 9, kind: input, shape index: {}]   ;;  %s4963_s10 = inlined_call_operand.vmem [shape: f32[1,256], index: 10, kind: input, shape index: {}]   ;;  %s4964_s11 = inlined_call_operand.vmem [shape: bf16[256,128], index: 11, kind: input, shape index: {}]   ;;  %s4965_s12 = inlined_call_operand.vmem [shape: f32[1,128], index: 12, kind: input, shape index: {}]   ;;  %s4966_s13 = inlined_call_operand.vmem [shape: f32[8,128], index: 13, kind: output, shape index: {}]  }
   0x1   :  { %19 = vsyncpa [#allocation5], 0  ;;  %s4614_s25 = smov [#allocation4]  }
   0x2   :  { %s49_s26 = sshll.u32 %s4614_s25, 4  ;;  %s50_s26 = int_to_ptr.vmem [resolvable:$true] %s49_s26 }
   0x3   :  { %s4558_s27 = scalar_lea.vmem %s50_s26, 32768  ;;  %p4563_p1 = scmp.lt.s32.totalorder %s50_s26, %s50_s26 }
   0x4   :  { %p4559_p0 = scmp.ne.s32.totalorder %s50_s26, %s4558_s27  ;;  %p4564_p2 = scmp.lt.s32.totalorder %s4558_s27, %s4558_s27 }
   0x6   :  { %p4565_p3 = por %p4564_p2, %p4563_p1 }
   0x8   :  { %p4566_p4 = pnand %p4565_p3, %p4559_p0 }
   0xa   :  { %4569 = shalt.err (!%p4566_p4)
}
   0xb   :  { %s4615_s28 = smov 256   ;;  %s4616_s29 = smov 16  }
   0xc   :  { %55 = dma.hbm_to_vmem [thread:$0]  %s4960_s7, 32768, %s50_s26, [#allocation5], %s4615_s28, %s4615_s28, %s4616_s29  }
   0xd   :  { %s4617_s15 = smov [#allocation2]  }
   0xe   :  { %s35_s16 = sshll.u32 %s4617_s15, 4  ;;  %s36_s16 = int_to_ptr.vmem [resolvable:$true] %s35_s16 }
   0xf   :  { %s4578_s17 = scalar_lea.vmem %s36_s16, 8192  ;;  %p4583_p6 = scmp.lt.s32.totalorder %s36_s16, %s36_s16 }
  0x10   :  { %p4579_p5 = scmp.ne.s32.totalorder %s36_s16, %s4578_s17  ;;  %p4584_p7 = scmp.lt.s32.totalorder %s4578_s17, %s4578_s17 }
  0x12   :  { %p4585_p8 = por %p4584_p7, %p4583_p6 }
  0x14   :  { %p4586_p9 = pnand %p4585_p8, %p4579_p5 }
  0x16   :  { %4589 = shalt.err (!%p4586_p9)
}
  0x17   :  { %s4618_s18 = smov 512   ;;  %s4619_s19 = smov 32  }
  0x18   :  { %41 = dma.hbm_to_vmem [thread:$0]  %s4958_s5, 8192, %s36_s16, [#allocation3], %s4618_s18, %s4618_s18, %s4619_s19  }
  0x19   :  { %s4620_s22 = smov [#allocation6]  }
  0x1a   :  { %s63_s23 = sshll.u32 %s4620_s22, 4  ;;  %s64_s23 = int_to_ptr.vmem [resolvable:$true] %s63_s23 }
  0x1b   :  { %s4598_s7 = scalar_lea.vmem %s64_s23, 8192  ;;  %p4603_p11 = scmp.lt.s32.totalorder %s64_s23, %s64_s23 }
  0x1c   :  { %p4599_p10 = scmp.ne.s32.totalorder %s64_s23, %s4598_s7  ;;  %p4604_p12 = scmp.lt.s32.totalorder %s4598_s7, %s4598_s7 }
  0x1e   :  { %p4605_p13 = por %p4604_p12, %p4603_p11 }
  0x20   :  { %p4606_p0 = pnand %p4605_p13, %p4599_p10 }
  0x22   :  { %4609 = shalt.err (!%p4606_p0)
}
  0x23   :  { %s4621_s24 = smov 128   ;;  %s4622_s25 = smov 8  }
  0x24   :  { %69 = dma.hbm_to_vmem [thread:$0]  %s4962_s9, 8192, %s64_s23, [#allocation5], %s4621_s24, %s4621_s24, %s4622_s25  }
  0x25   :  { %4610 = dma.done.wait [#allocation3], 8192  }
  0x26   :  { %4611 = vsyncadd [#allocation3], 4294959104 }
  0x27   :  { %4612 = dma.done.wait [#allocation5], 40960  }
  0x28   :  { %4613 = vsyncadd [#allocation5], 4294926336  ;;  %v4623_v0 = vmov 0.0   ;;  %vm4624_vm0 = vmmov 0   ;;  %v4053_v1 = vld [vmem:[%s4955_s2] sm:$0xff]   ;;  %vm104_vm1 = vcmask 130048  }
  0x29   :  { %4035 = vmatprep.subr.bf16.mxu0 %v4623_v0  ;;  %4037 = vmatprep.mubr.msk.bf16.mxu0 %vm4624_vm0, %v4623_v0  ;;  %v87_v2 = vld [vmem:[%s4954_s1] sm:$0xff]  ;;  %v224_v7 = vld [vmem:[#allocation2 + $0x1c8] sm:$0xff]  ;;  %vm795_vm2 = vcmask 261120  }
  0x2a   :  { %v223_v3 = vld [vmem:[#allocation2 + $0x1c0] sm:$0xff]  ;;  %4036 = vmatpush3.bf16.msra.mxu0 %v4053_v1  ;;  %v88_v5 = vpack.c.bf16 %v87_v2, %v87_v2  ;;  %v228_v8 = vld [vmem:[#allocation2 + $0x1e8] sm:$0xff] }
  0x2b   :  { %v227_v4 = vld [vmem:[#allocation2 + $0x1e0] sm:$0xff]  ;;  %v3648_v11 = vcombine.low %v224_v7, %v228_v8  ;;  %v3649_v12 = vcombine.high %v224_v7, %v228_v8  ;;  %v216_v14 = vld [vmem:[#allocation2 + $0x188] sm:$0xff]  ;;  %v230_v8 = vld [vmem:[#allocation2 + $0x1f8] sm:$0xff] }
  0x2c   :  { %v3647_v6 = vcombine.high %v223_v3, %v227_v4  ;;  %v3646_v9 = vcombine.low %v223_v3, %v227_v4  ;;  %v215_v10 = vld [vmem:[#allocation2 + $0x180] sm:$0xff]  ;;  %v220_v15 = vld [vmem:[#allocation2 + $0x1a8] sm:$0xff]  ;;  %v225_v4 = vld [vmem:[#allocation2 + $0x1d0] sm:$0xff] }
  0x2d   :  { %v219_v13 = vld [vmem:[#allocation2 + $0x1a0] sm:$0xff]  ;;  %v3641_v17 = vcombine.high %v216_v14, %v220_v15  ;;  %v208_v20 = vld [vmem:[#allocation2 + $0x148] sm:$0xff]  ;;  %4038 = vmatmul.mubr.msk.bf16.vlgmr.msra.gmra.mxu0 %vm104_vm1, %v88_v5  ;;  %592 = vmatprep.subr.bf16.mxu0 %v3649_v12  ;;  %v3640_v22 = vcombine.low %v216_v14, %v220_v15  ;;  %v229_v5 = vld [vmem:[#allocation2 + $0x1f0] sm:$0xff]  ;;  %v4625_v12 = vmov 0  }
  0x2e   :  { %551 = vmatprep.subr.bf16.mxu1 %v3647_v6  ;;  %v3639_v16 = vcombine.high %v215_v10, %v219_v13  ;;  %v207_v18 = vld [vmem:[#allocation2 + $0x140] sm:$0xff]  ;;  %v212_v21 = vld [vmem:[#allocation2 + $0x168] sm:$0xff]  ;;  %593 = vmatpush1.bf16.msra.mxu0 %v3648_v11  ;;  %v3638_v23 = vcombine.low %v215_v10, %v219_v13  ;;  %v226_v6 = vld [vmem:[#allocation2 + $0x1d8] sm:$0xff]  ;;  %v3651_v7 = vcombine.high %v225_v4, %v229_v5 }
  0x2f   :  { %v211_v19 = vld [vmem:[#allocation2 + $0x160] sm:$0xff]  ;;  %552 = vmatpush1.bf16.msra.mxu1 %v3646_v9  ;;  %594 = vmatprep.subr.bf16.mxu0 %v3641_v17  ;;  %v3633_v25 = vcombine.high %v208_v20, %v212_v21  ;;  %v200_v28 = vld [vmem:[#allocation2 + $0x108] sm:$0xff]  ;;  %v3632_v30 = vcombine.low %v208_v20, %v212_v21  ;;  %v3650_v9 = vcombine.low %v225_v4, %v229_v5  ;;  %v222_v20 = vld [vmem:[#allocation2 + $0x1b8] sm:$0xff] }
  0x30   :  { %553 = vmatprep.subr.bf16.mxu1 %v3639_v16  ;;  %v3631_v24 = vcombine.high %v207_v18, %v211_v19  ;;  %v199_v26 = vld [vmem:[#allocation2 + $0x100] sm:$0xff]  ;;  %v204_v29 = vld [vmem:[#allocation2 + $0x128] sm:$0xff]  ;;  %v3630_v31 = vcombine.low %v207_v18, %v211_v19  ;;  %v3652_v10 = vcombine.low %v226_v6, %v230_v8  ;;  %v3653_v11 = vcombine.high %v226_v6, %v230_v8  ;;  %v217_v16 = vld [vmem:[#allocation2 + $0x190] sm:$0xff] }
  0x31   :  { %v203_v27 = vld [vmem:[#allocation2 + $0x120] sm:$0xff]  ;;  %v192_v34 = vld [vmem:[#allocation2 + $0xc8] sm:$0xff]  ;;  %v3625_v37 = vcombine.high %v200_v28, %v204_v29  ;;  %v3624_v38 = vcombine.low %v200_v28, %v204_v29  ;;  %583 = vmatprep.mubr.bf16.mxu1 %v4625_v12  ;;  %624 = vmatprep.mubr.bf16.mxu0 %v4625_v12  ;;  %v221_v18 = vld [vmem:[#allocation2 + $0x1b0] sm:$0xff] }
  0x32   :  { %595 = vmatpush1.bf16.msra.mxu0 %v3640_v22  ;;  %v191_v32 = vld [vmem:[#allocation2 + $0xc0] sm:$0xff]  ;;  %v196_v35 = vld [vmem:[#allocation2 + $0xe8] sm:$0xff]  ;;  %v3623_v36 = vcombine.high %v199_v26, %v203_v27  ;;  %v3622_v39 = vcombine.low %v199_v26, %v203_v27  ;;  %v218_v19 = vld [vmem:[#allocation2 + $0x198] sm:$0xff] }
  0x33   :  { %554 = vmatpush1.bf16.msra.mxu1 %v3638_v23  ;;  %v195_v33 = vld [vmem:[#allocation2 + $0xe0] sm:$0xff]  ;;  %596 = vmatprep.subr.bf16.mxu0 %v3633_v25  ;;  %v184_v42 = vld [vmem:[#allocation2 + $0x88] sm:$0xff]  ;;  %v3617_v45 = vcombine.high %v192_v34, %v196_v35  ;;  %v3616_v46 = vcombine.low %v192_v34, %v196_v35  ;;  %v3645_v25 = vcombine.high %v218_v19, %v222_v20  ;;  %v209_v26 = vld [vmem:[#allocation2 + $0x150] sm:$0xff] }
  0x34   :  { %555 = vmatprep.subr.bf16.mxu1 %v3631_v24  ;;  %v183_v40 = vld [vmem:[#allocation2 + $0x80] sm:$0xff]  ;;  %v188_v43 = vld [vmem:[#allocation2 + $0xa8] sm:$0xff]  ;;  %v3615_v44 = vcombine.high %v191_v32, %v195_v33  ;;  %v3614_v47 = vcombine.low %v191_v32, %v195_v33  ;;  %v3643_v24 = vcombine.high %v217_v16, %v221_v18  ;;  %v213_v28 = vld [vmem:[#allocation2 + $0x170] sm:$0xff]  ;;  %v3644_v32 = vcombine.low %v218_v19, %v222_v20 }
  0x35   :  { %v187_v41 = vld [vmem:[#allocation2 + $0xa0] sm:$0xff]  ;;  %v176_v50 = vld [vmem:[#allocation2 + $0x48] sm:$0xff]  ;;  %v3609_v53 = vcombine.high %v184_v42, %v188_v43  ;;  %v3608_v54 = vcombine.low %v184_v42, %v188_v43  ;;  %v210_v29 = vld [vmem:[#allocation2 + $0x158] sm:$0xff]  ;;  %v3635_v33 = vcombine.high %v209_v26, %v213_v28 }
  0x36   :  { %597 = vmatpush1.bf16.msra.mxu0 %v3632_v30  ;;  %v175_v48 = vld [vmem:[#allocation2 + $0x40] sm:$0xff]  ;;  %v180_v51 = vld [vmem:[#allocation2 + $0x68] sm:$0xff]  ;;  %v3607_v52 = vcombine.high %v183_v40, %v187_v41  ;;  %v3606_v55 = vcombine.low %v183_v40, %v187_v41  ;;  %v214_v30 = vld [vmem:[#allocation2 + $0x178] sm:$0xff] }
  0x37   :  { %556 = vmatpush1.bf16.msra.mxu1 %v3630_v31  ;;  %598 = vmatprep.subr.bf16.mxu0 %v3625_v37  ;;  %v179_v49 = vld [vmem:[#allocation2 + $0x60] sm:$0xff]  ;;  %v3601_v57 = vcombine.high %v176_v50, %v180_v51  ;;  %v3600_v58 = vcombine.low %v176_v50, %v180_v51  ;;  %v168_v62 = vld [vmem:[#allocation2 + $0x8] sm:$0xff]  ;;  %v3642_v31 = vcombine.low %v217_v16, %v221_v18  ;;  %v201_v35 = vld [vmem:[#allocation2 + $0x110] sm:$0xff] }
  0x38   :  { %557 = vmatprep.subr.bf16.mxu1 %v3623_v36  ;;  %v3599_v56 = vcombine.high %v175_v48, %v179_v49  ;;  %v3598_v59 = vcombine.low %v175_v48, %v179_v49  ;;  %v167_v60 = vld [vmem:[#allocation2] sm:$0xff]  ;;  %v172_v0 = vld [vmem:[#allocation2 + $0x28] sm:$0xff]  ;;  %v3637_v34 = vcombine.high %v210_v29, %v214_v30  ;;  %v205_v36 = vld [vmem:[#allocation2 + $0x130] sm:$0xff]  ;;  %v3636_v40 = vcombine.low %v210_v29, %v214_v30 }
  0x39   :  { %v171_v61 = vld [vmem:[#allocation2 + $0x20] sm:$0xff]  ;;  %v3592_v1 = vcombine.low %v168_v62, %v172_v0  ;;  %v3593_v2 = vcombine.high %v168_v62, %v172_v0  ;;  %v202_v37 = vld [vmem:[#allocation2 + $0x118] sm:$0xff]  ;;  %v3627_v41 = vcombine.high %v201_v35, %v205_v36  ;;  %v193_v43 = vld [vmem:[#allocation2 + $0xd0] sm:$0xff] }
  0x3a   :  { %599 = vmatpush1.bf16.msra.mxu0 %v3624_v38  ;;  %v3591_v63 = vcombine.high %v167_v60, %v171_v61  ;;  %v3590_v3 = vcombine.low %v167_v60, %v171_v61  ;;  %v3587_v13 = vld [vmem:[%s4956_s3] ss:$0 sm:$0xff]  ;;  %v206_v38 = vld [vmem:[#allocation2 + $0x138] sm:$0xff]  ;;  %v185_v51 = vld [vmem:[#allocation2 + $0x90] sm:$0xff] }
  0x3b   :  { %558 = vmatpush1.bf16.msra.mxu1 %v3622_v39  ;;  %600 = vmatprep.subr.bf16.mxu0 %v3617_v45  ;;  %v3634_v39 = vcombine.low %v209_v26, %v213_v28  ;;  %v3629_v42 = vcombine.high %v202_v37, %v206_v38  ;;  %v194_v45 = vld [vmem:[#allocation2 + $0xd8] sm:$0xff]  ;;  %v3628_v48 = vcombine.low %v202_v37, %v206_v38  ;;  %v181_v60 = vld [vmem:[#allocation2 + $0x70] sm:$0xff]  ;;  %v150_v18 = vld [vmem:[%s4957_s4] sm:$0xff] }
  0x3c   :  { %559 = vmatprep.subr.bf16.mxu1 %v3615_v44  ;;  %v197_v44 = vld [vmem:[#allocation2 + $0xf0] sm:$0xff]  ;;  %v178_v61 = vld [vmem:[#allocation2 + $0x58] sm:$0xff]  ;;  %v154_v19 = vld [vmem:[%s4957_s4 + $0x20] sm:$0xff] }
  0x3d   :  { %v3619_v49 = vcombine.high %v193_v43, %v197_v44  ;;  %v182_v62 = vld [vmem:[#allocation2 + $0x78] sm:$0xff]  ;;  %v173_v4 = vld [vmem:[#allocation2 + $0x30] sm:$0xff]  ;;  %v86_v28 = vld [vmem:[%s4953_s0] sm:$0xff] }
  0x3e   :  { %601 = vmatpush1.bf16.msra.mxu0 %v3616_v46  ;;  %v198_v46 = vld [vmem:[#allocation2 + $0xf8] sm:$0xff]  ;;  %v3604_v8 = vcombine.low %v178_v61, %v182_v62  ;;  %v4059_v26 = vld [vmem:[#allocation4 + $0xc4] ss:$16 sps:$4 sm:$0xff]   ;;  %v4057_v30 = vld [vmem:[#allocation4 + $0xc0] ss:$16 sps:$4 sm:$0xff]  }
  0x3f   :  { %560 = vmatpush1.bf16.msra.mxu1 %v3614_v47  ;;  %602 = vmatprep.subr.bf16.mxu0 %v3609_v53  ;;  %v3626_v47 = vcombine.low %v201_v35, %v205_v36  ;;  %v3621_v50 = vcombine.high %v194_v45, %v198_v46  ;;  %v186_v53 = vld [vmem:[#allocation2 + $0x98] sm:$0xff]  ;;  %v4060_v36 = vld [vmem:[#allocation4 + $0xa0] ss:$16 sps:$4 sm:$0xff]  }
  0x40   :  { %561 = vmatprep.subr.bf16.mxu1 %v3607_v52  ;;  %v189_v52 = vld [vmem:[#allocation2 + $0xb0] sm:$0xff]  ;;  %v170_v5 = vld [vmem:[#allocation2 + $0x18] sm:$0xff] }
  0x41   :  { %v174_v6 = vld [vmem:[#allocation2 + $0x38] sm:$0xff]  ;;  %v160_v37 = vld [vmem:[%s4957_s4 + $0x50] sm:$0xff] }
  0x42   :  { %603 = vmatpush1.bf16.msra.mxu0 %v3608_v54  ;;  %v190_v54 = vld [vmem:[#allocation2 + $0xb8] sm:$0xff]  ;;  %v164_v38 = vld [vmem:[%s4957_s4 + $0x70] sm:$0xff] }
  0x43   :  { %562 = vmatpush1.bf16.msra.mxu1 %v3606_v55  ;;  %604 = vmatprep.subr.bf16.mxu0 %v3601_v57  ;;  %v3618_v55 = vcombine.low %v193_v43, %v197_v44  ;;  %v3611_v57 = vcombine.high %v185_v51, %v189_v52  ;;  %v3612_v0 = vcombine.low %v186_v53, %v190_v54  ;;  %v152_v43 = vld [vmem:[%s4957_s4 + $0x10] sm:$0xff] }
  0x44   :  { %563 = vmatprep.subr.bf16.mxu1 %v3599_v56  ;;  %v3620_v56 = vcombine.low %v194_v45, %v198_v46  ;;  %v156_v44 = vld [vmem:[%s4957_s4 + $0x30] sm:$0xff]  ;;  %v3666_v45 = vcombine.low %v160_v37, %v164_v38 }
  0x45   :  { %v3659_v46 = vcombine.high %v152_v43, %v156_v44 }
  0x46   :  { %605 = vmatpush1.bf16.msra.mxu0 %v3600_v58  ;;  %v3613_v58 = vcombine.high %v186_v53, %v190_v54 }
  0x47   :  { %564 = vmatpush1.bf16.msra.mxu1 %v3598_v59  ;;  %606 = vmatprep.subr.bf16.mxu0 %v3593_v2  ;;  %v177_v59 = vld [vmem:[#allocation2 + $0x50] sm:$0xff]  ;;  %v3605_v2 = vcombine.high %v178_v61, %v182_v62 }
  0x48   :  { %565 = vmatprep.subr.bf16.mxu1 %v3591_v63  ;;  %v3610_v63 = vcombine.low %v185_v51, %v189_v52  ;;  %v153_v51 = vld [vmem:[%s4957_s4 + $0x18] sm:$0xff]  ;;  %v4072_v61 = vld [vmem:[#allocation4 + $0x60] ss:$16 sps:$4 sm:$0xff]   ;;  %v4077_v62 = vld [vmem:[#allocation4 + $0x2a4] ss:$16 sps:$4 sm:$0xff]  }
  0x49   :  { %v157_v52 = vld [vmem:[%s4957_s4 + $0x38] sm:$0xff] }
  0x4a   :  { %607 = vmatpush1.bf16.msra.mxu0 %v3592_v1  ;;  %v3603_v1 = vcombine.high %v177_v59, %v181_v60  ;;  %v3661_v54 = vcombine.high %v153_v51, %v157_v52 }
  0x4b   :  { %566 = vmatpush1.bf16.msra.mxu1 %v3590_v3  ;;  %674 = vmatprep.subr.bf16.mxu0 %v3653_v11  ;;  %v169_v3 = vld [vmem:[#allocation2 + $0x10] sm:$0xff]  ;;  %v158_v11 = vld [vmem:[%s4957_s4 + $0x40] sm:$0xff] }
  0x4c   :  { %633 = vmatprep.subr.bf16.mxu1 %v3651_v7  ;;  %v3602_v7 = vcombine.low %v177_v59, %v181_v60  ;;  %v4069_v59 = vld [vmem:[#allocation4 + $0x2c0] ss:$16 sps:$4 sm:$0xff]   ;;  %v4074_v60 = vld [vmem:[#allocation4 + $0x64] ss:$16 sps:$4 sm:$0xff]  }
  0xed   :  { %v142_v14 = vpop.f32.mrf.mxu0 }
  0xee   :  { %v143_v15 = vadd.f32 %v3587_v13, %v142_v14  ;;  %v162_v13 = vld [vmem:[%s4957_s4 + $0x60] sm:$0xff]  ;;  %v3594_v14 = vcombine.low %v169_v3, %v173_v4 }
  0xef   :  { %v4039_v17 = vpop.f32.mrf.mxu0  ;;  %v3663_v16 = vcombine.high %v158_v11, %v162_v13  ;;  %v3662_v20 = vcombine.low %v158_v11, %v162_v13  ;;  %v4096_v11 = vld [vmem:[#allocation4 + $0x1e0] ss:$16 sps:$4 sm:$0xff]  }
  0xf0   :  { %v148_v21 = vmax.f32 %v143_v15, 0.0  ;;  %v3596_v15 = vcombine.low %v170_v5, %v174_v6  ;;  %v4056_v17 = vld [vmem:[#allocation4 + $0xe4] ss:$16 sps:$4 sm:$0xff]   ;;  %v4093_v13 = vld [vmem:[#allocation4 + $0x240] ss:$16 sps:$4 sm:$0xff]  }
  0xf1   :  { %v145_v22 = vpop.f32.mrf.mxu0 }
  0xf2   :  { %v4717_v23 = vpack.c.bf16 %v148_v21, %v148_v21  ;;  %v3655_v21 = vcombine.high %v150_v18, %v154_v19  ;;  %v4054_v22 = vld [vmem:[#allocation4 + $0xe0] ss:$16 sps:$4 sm:$0xff]  }
  0xf3   :  { %v4040_v27 = vpop.f32.mrf.mxu0 }
  0xf4   :  { %584 = vmatmul.mubr.bf16.vlgmr.msra.gmra.mxu1 %v4717_v23  ;;  %625 = vmatmul.mubr.bf16.vlgmr.msra.gmra.mxu0 %v4717_v23  ;;  %v3654_v27 = vcombine.low %v150_v18, %v154_v19  ;;  %v4110_v18 = vld [vmem:[#allocation4 + $0x1a4] ss:$16 sps:$4 sm:$0xff]  }
  0xf5   :  { %634 = vmatpush1.bf16.msra.mxu1 %v3650_v9  ;;  %675 = vmatpush1.bf16.msra.mxu0 %v3652_v10  ;;  %v3595_v9 = vcombine.high %v169_v3, %v173_v4  ;;  %v3597_v10 = vcombine.high %v170_v5, %v174_v6  ;;  %v4084_v3 = vld [vmem:[#allocation4 + $0x20] ss:$16 sps:$4 sm:$0xff]   ;;  %v4092_v5 = vld [vmem:[#allocation4 + $0x4] ss:$16 sps:$4 sm:$0xff]  }
  0xf6   :  { %635 = vmatprep.subr.bf16.mxu1 %v3643_v24  ;;  %676 = vmatprep.subr.bf16.mxu0 %v3645_v25  ;;  %v159_v24 = vld [vmem:[%s4957_s4 + $0x48] sm:$0xff]  ;;  %v4081_v4 = vld [vmem:[#allocation4 + $0x280] ss:$16 sps:$4 sm:$0xff]   ;;  %v4089_v6 = vld [vmem:[#allocation4 + $0x264] ss:$16 sps:$4 sm:$0xff]  }
  0xf7   :  { %665 = vmatprep.mubr.bf16.mxu1 %v4625_v12  ;;  %706 = vmatprep.mubr.bf16.mxu0 %v4625_v12  ;;  %v163_v25 = vld [vmem:[%s4957_s4 + $0x68] sm:$0xff]  ;;  %v4107_v19 = vld [vmem:[#allocation4 + $0x204] ss:$16 sps:$4 sm:$0xff]  }
  0xf8   :  { %v3665_v29 = vcombine.high %v159_v24, %v163_v25 }
  0xf9   :  { %636 = vmatpush1.bf16.msra.mxu1 %v3642_v31  ;;  %677 = vmatpush1.bf16.msra.mxu0 %v3644_v32  ;;  %v151_v31 = vld [vmem:[%s4957_s4 + $0x8] sm:$0xff]  ;;  %v4062_v32 = vld [vmem:[#allocation4 + $0xa4] ss:$16 sps:$4 sm:$0xff]  }
  0xfa   :  { %637 = vmatprep.subr.bf16.mxu1 %v3635_v33  ;;  %678 = vmatprep.subr.bf16.mxu0 %v3637_v34  ;;  %v149_v33 = vpack.c.bf16 %v86_v28, %v86_v28  ;;  %v3664_v34 = vcombine.low %v159_v24, %v163_v25  ;;  %v4113_v24 = vld [vmem:[#allocation4 + $0x3e4] ss:$16 sps:$4 sm:$0xff]   ;;  %v4114_v25 = vld [vmem:[#allocation4 + $0x180] ss:$16 sps:$4 sm:$0xff]  }
  0xfb   :  { %v4117_v28 = vld [vmem:[#allocation4 + $0x3c0] ss:$16 sps:$4 sm:$0xff]  }
  0xfd   :  { %638 = vmatpush1.bf16.msra.mxu1 %v3634_v39  ;;  %679 = vmatpush1.bf16.msra.mxu0 %v3636_v40  ;;  %v4068_v39 = vld [vmem:[#allocation4 + $0x84] ss:$16 sps:$4 sm:$0xff]  }
  0xfe   :  { %639 = vmatprep.subr.bf16.mxu1 %v3627_v41  ;;  %680 = vmatprep.subr.bf16.mxu0 %v3629_v42  ;;  %v3667_v41 = vcombine.high %v160_v37, %v164_v38  ;;  %v4066_v42 = vld [vmem:[#allocation4 + $0x80] ss:$16 sps:$4 sm:$0xff]   ;;  %v4137_v38 = vld [vmem:[#allocation4 + $0x364] ss:$16 sps:$4 sm:$0xff]  }
  0xff   :  { %v4132_v37 = vld [vmem:[#allocation4 + $0x120] ss:$16 sps:$4 sm:$0xff]  }
 0x101   :  { %640 = vmatpush1.bf16.msra.mxu1 %v3626_v47  ;;  %681 = vmatpush1.bf16.msra.mxu0 %v3628_v48  ;;  %v161_v47 = vld [vmem:[%s4957_s4 + $0x58] sm:$0xff] }
 0x102   :  { %641 = vmatprep.subr.bf16.mxu1 %v3619_v49  ;;  %682 = vmatprep.subr.bf16.mxu0 %v3621_v50  ;;  %v165_v48 = vld [vmem:[%s4957_s4 + $0x78] sm:$0xff]  ;;  %v3658_v49 = vcombine.low %v152_v43, %v156_v44  ;;  %v4141_v43 = vld [vmem:[#allocation4 + $0x340] ss:$16 sps:$4 sm:$0xff]   ;;  %v4149_v44 = vld [vmem:[#allocation4 + $0x4e4] ss:$16 sps:$4 sm:$0xff]  }
 0x103   :  { %v3669_v50 = vcombine.high %v161_v47, %v165_v48  ;;  %v3668_v53 = vcombine.low %v161_v47, %v165_v48  ;;  %v4144_v47 = vld [vmem:[#allocation4 + $0x320] ss:$16 sps:$4 sm:$0xff]  }
 0x105   :  { %642 = vmatpush1.bf16.msra.mxu1 %v3618_v55  ;;  %683 = vmatpush1.bf16.msra.mxu0 %v3620_v56  ;;  %v3660_v55 = vcombine.low %v153_v51, %v157_v52  ;;  %v4065_v56 = vld [vmem:[#allocation4 + $0x2e4] ss:$16 sps:$4 sm:$0xff]   ;;  %v4150_v52 = vld [vmem:[#allocation4 + $0x300] ss:$16 sps:$4 sm:$0xff]  }
 0x106   :  { %643 = vmatprep.subr.bf16.mxu1 %v3611_v57  ;;  %684 = vmatprep.subr.bf16.mxu0 %v3613_v58  ;;  %v4063_v57 = vld [vmem:[#allocation4 + $0x2e0] ss:$16 sps:$4 sm:$0xff]   ;;  %v4071_v58 = vld [vmem:[#allocation4 + $0x2c4] ss:$16 sps:$4 sm:$0xff]  }
 0x107   :  { %v4790_v51 = vld [vmem:[%s4959_s6] sm:$0xff] }
 0x109   :  { %644 = vmatpush1.bf16.msra.mxu1 %v3610_v63  ;;  %685 = vmatpush1.bf16.msra.mxu0 %v3612_v0  ;;  %v4075_v63 = vld [vmem:[#allocation4 + $0x2a0] ss:$16 sps:$4 sm:$0xff]   ;;  %v4080_v0 = vld [vmem:[#allocation4 + $0x44] ss:$16 sps:$4 sm:$0xff]  }
 0x10a   :  { %645 = vmatprep.subr.bf16.mxu1 %v3603_v1  ;;  %686 = vmatprep.subr.bf16.mxu0 %v3605_v2  ;;  %v4083_v1 = vld [vmem:[#allocation4 + $0x284] ss:$16 sps:$4 sm:$0xff]  }
 0x10b   :  { %v4086_v2 = vld [vmem:[#allocation4 + $0x24] ss:$16 sps:$4 sm:$0xff]  }
 0x10d   :  { %646 = vmatpush1.bf16.msra.mxu1 %v3602_v7  ;;  %687 = vmatpush1.bf16.msra.mxu0 %v3604_v8  ;;  %v4090_v7 = vld [vmem:[#allocation4] ss:$16 sps:$4 sm:$0xff]  }
 0x10e   :  { %647 = vmatprep.subr.bf16.mxu1 %v3595_v9  ;;  %688 = vmatprep.subr.bf16.mxu0 %v3597_v10  ;;  %v4087_v8 = vld [vmem:[#allocation4 + $0x260] ss:$16 sps:$4 sm:$0xff]   ;;  %v4098_v9 = vld [vmem:[#allocation4 + $0x1e4] ss:$16 sps:$4 sm:$0xff]  }
 0x10f   :  { %v4095_v10 = vld [vmem:[#allocation4 + $0x244] ss:$16 sps:$4 sm:$0xff]  }
 0x111   :  { %648 = vmatpush1.bf16.msra.mxu1 %v3594_v14  ;;  %689 = vmatpush1.bf16.msra.mxu0 %v3596_v15  ;;  %v4104_v14 = vld [vmem:[#allocation4 + $0x1c4] ss:$16 sps:$4 sm:$0xff]  }
 0x112   :  { %811 = vmatprep.subr.bf16.mxu0 %v3663_v16  ;;  %2587 = vmatprep.subr.bf16.mxu1 %v4056_v17  ;;  %v4101_v15 = vld [vmem:[#allocation4 + $0x224] ss:$16 sps:$4 sm:$0xff]   ;;  %v4102_v16 = vld [vmem:[#allocation4 + $0x1c0] ss:$16 sps:$4 sm:$0xff]  }
 0x113   :  { %v4099_v17 = vld [vmem:[#allocation4 + $0x220] ss:$16 sps:$4 sm:$0xff]  }
 0x114   :  { %666 = vmatmul.mubr.bf16.vlgmr.msra.gmra.mxu1 %v4717_v23  ;;  %707 = vmatmul.mubr.bf16.vlgmr.msra.gmra.mxu0 %v4717_v23  ;;  %v155_v23 = vld [vmem:[%s4957_s4 + $0x28] sm:$0xff] }
 0x115   :  { %812 = vmatpush1.bf16.msra.mxu0 %v3662_v20  ;;  %831 = vmatprep.mubr.bf16.mxu0 %v4625_v12  ;;  %v3657_v35 = vcombine.high %v151_v31, %v155_v23  ;;  %v3656_v40 = vcombine.low %v151_v31, %v155_v23  ;;  %v4108_v20 = vld [vmem:[#allocation4 + $0x1a0] ss:$16 sps:$4 sm:$0xff]   ;;  %v4125_v31 = vld [vmem:[#allocation4 + $0x3a4] ss:$16 sps:$4 sm:$0xff]  }
 0x116   :  { %813 = vmatprep.subr.bf16.mxu0 %v3655_v21  ;;  %2588 = vmatpush1.bf16.msra.mxu1 %v4054_v22  ;;  %v4105_v21 = vld [vmem:[#allocation4 + $0x200] ss:$16 sps:$4 sm:$0xff]   ;;  %v4116_v22 = vld [vmem:[#allocation4 + $0x184] ss:$16 sps:$4 sm:$0xff]  }
 0x117   :  { %2589 = vmatprep.subr.bf16.mxu1 %v4059_v26  ;;  %v4111_v26 = vld [vmem:[#allocation4 + $0x3e0] ss:$16 sps:$4 sm:$0xff]  }
 0x118   :  { %v4123_v23 = vld [vmem:[#allocation4 + $0x3a0] ss:$16 sps:$4 sm:$0xff]  }
 0x119   :  { %814 = vmatpush1.bf16.msra.mxu0 %v3654_v27  ;;  %v4119_v27 = vld [vmem:[#allocation4 + $0x3c4] ss:$16 sps:$4 sm:$0xff]  }
 0x11a   :  { %852 = vmatprep.subr.bf16.mxu0 %v3665_v29  ;;  %2590 = vmatpush1.bf16.msra.mxu1 %v4057_v30  ;;  %v4122_v29 = vld [vmem:[#allocation4 + $0x164] ss:$16 sps:$4 sm:$0xff]   ;;  %v4120_v30 = vld [vmem:[#allocation4 + $0x160] ss:$16 sps:$4 sm:$0xff]  }
 0x11b   :  { %2591 = vmatprep.subr.bf16.mxu1 %v4062_v32  ;;  %v4128_v32 = vld [vmem:[#allocation4 + $0x144] ss:$16 sps:$4 sm:$0xff]  }
 0x11c   :  { %3670 = vmatmul.mubr.msk.bf16.vlgmr.msra.gmra.mxu0 %vm795_vm2, %v149_v33 }
 0x11d   :  { %853 = vmatpush1.bf16.msra.mxu0 %v3664_v34  ;;  %872 = vmatprep.mubr.bf16.mxu0 %v4625_v12  ;;  %v4131_v34 = vld [vmem:[#allocation4 + $0x384] ss:$16 sps:$4 sm:$0xff]  }
 0x11e   :  { %854 = vmatprep.subr.bf16.mxu0 %v3657_v35  ;;  %2592 = vmatpush1.bf16.msra.mxu1 %v4060_v36  ;;  %v4129_v35 = vld [vmem:[#allocation4 + $0x380] ss:$16 sps:$4 sm:$0xff]   ;;  %v4134_v36 = vld [vmem:[#allocation4 + $0x124] ss:$16 sps:$4 sm:$0xff]  }
 0x11f   :  { %2593 = vmatprep.subr.bf16.mxu1 %v4068_v39  ;;  %v4135_v39 = vld [vmem:[#allocation4 + $0x360] ss:$16 sps:$4 sm:$0xff]  }
 0x121   :  { %855 = vmatpush1.bf16.msra.mxu0 %v3656_v40  ;;  %v4140_v40 = vld [vmem:[#allocation4 + $0x104] ss:$16 sps:$4 sm:$0xff]  }
 0x122   :  { %893 = vmatprep.subr.bf16.mxu0 %v3667_v41  ;;  %2594 = vmatpush1.bf16.msra.mxu1 %v4066_v42  ;;  %v4138_v41 = vld [vmem:[#allocation4 + $0x100] ss:$16 sps:$4 sm:$0xff]   ;;  %v4143_v42 = vld [vmem:[#allocation4 + $0x344] ss:$16 sps:$4 sm:$0xff]  }
 0x123   :  { %2595 = vmatprep.subr.bf16.mxu1 %v4074_v60 }
 0x124   :  { %3671 = vmatmul.mubr.msk.bf16.vlgmr.msra.gmra.mxu0 %vm795_vm2, %v149_v33 }
 0x125   :  { %894 = vmatpush1.bf16.msra.mxu0 %v3666_v45  ;;  %913 = vmatprep.mubr.bf16.mxu0 %v4625_v12  ;;  %v965_v45 = vlaneseq }
 0x126   :  { %895 = vmatprep.subr.bf16.mxu0 %v3659_v46  ;;  %2596 = vmatpush1.bf16.msra.mxu1 %v4072_v61  ;;  %v4146_v46 = vld [vmem:[#allocation4 + $0x324] ss:$16 sps:$4 sm:$0xff]  }
 0x127   :  { %2597 = vmatprep.subr.bf16.mxu1 %v4080_v0  ;;  %v4784_v48 = vshrl.u32 %v965_v45, 7 }
 0x129   :  { %896 = vmatpush1.bf16.msra.mxu0 %v3658_v49  ;;  %v4152_v49 = vld [vmem:[#allocation4 + $0x304] ss:$16 sps:$4 sm:$0xff]  }
 0x12a   :  { %934 = vmatprep.subr.bf16.mxu0 %v3669_v50  ;;  %v983_v50 = vsub.s32 4, %v4784_v48 }
 0x12c   :  { %3672 = vmatmul.mubr.msk.bf16.vlgmr.msra.gmra.mxu0 %vm795_vm2, %v149_v33 }
 0x12d   :  { %935 = vmatpush1.bf16.msra.mxu0 %v3668_v53  ;;  %954 = vmatprep.mubr.bf16.mxu0 %v4625_v12  ;;  %v4078_v12 = vld [vmem:[#allocation4 + $0x40] ss:$16 sps:$4 sm:$0xff]   ;;  %v4793_v53 = vrot.slane %v4790_v51, %v983_v50 }
 0x12e   :  { %936 = vmatprep.subr.bf16.mxu0 %v3661_v54  ;;  %2598 = vmatpush1.bf16.msra.mxu1 %v4078_v12  ;;  %v4161_v54 = vld [vmem:[#allocation4 + $0x6e4] ss:$16 sps:$4 sm:$0xff]   ;;  %v4159_v50 = vld [vmem:[#allocation4 + $0x6e0] ss:$16 sps:$4 sm:$0xff]  }
 0x12f   :  { %2599 = vmatprep.subr.bf16.mxu1 %v4086_v2 }
 0x131   :  { %937 = vmatpush1.bf16.msra.mxu0 %v3660_v55  ;;  %v991_v55 = vsub.s32 6, %v4784_v48 }
 0x132   :  { %2628 = vmatprep.subr.bf16.mxu0 %v4065_v56  ;;  %2600 = vmatpush1.bf16.msra.mxu1 %v4084_v3 }
 0x133   :  { %2601 = vmatprep.subr.bf16.mxu1 %v4092_v5  ;;  %v4797_v56 = vrot.slane %v4790_v51, %v991_v55  ;;  %v4164_v55 = vld [vmem:[#allocation4 + $0x484] ss:$16 sps:$4 sm:$0xff]  }
 0x134   :  { %3673 = vmatmul.mubr.msk.bf16.vlgmr.msra.gmra.mxu0 %vm795_vm2, %v149_v33  ;;  %v4126_v33 = vld [vmem:[#allocation4 + $0x140] ss:$16 sps:$4 sm:$0xff]  }
 0x135   :  { %2629 = vmatpush1.bf16.msra.mxu0 %v4063_v57 }
 0x136   :  { %2630 = vmatprep.subr.bf16.mxu0 %v4071_v58  ;;  %2602 = vmatpush1.bf16.msra.mxu1 %v4090_v7  ;;  %v4807_v7 = vsub.s32 1, %v4784_v48 }
 0x137   :  { %2603 = vmatprep.subr.bf16.mxu1 %v4098_v9 }
 0x139   :  { %2631 = vmatpush1.bf16.msra.mxu0 %v4069_v59 }
 0x13a   :  { %2632 = vmatprep.subr.bf16.mxu0 %v4077_v62  ;;  %2604 = vmatpush2.bf16.msra.mxu1 %v4096_v11 }
 0x13b   :  { %2605 = vmatprep.subr.bf16.mxu1 %v4104_v14  ;;  %v972_v14 = vrot.slane %v4790_v51, %v4807_v7 }
 0x13d   :  { %2633 = vmatpush1.bf16.msra.mxu0 %v4075_v63 }
 0x13e   :  { %2634 = vmatprep.subr.bf16.mxu0 %v4083_v1  ;;  %2606 = vmatpush2.bf16.msra.mxu1 %v4102_v16 }
 0x13f   :  { %2607 = vmatprep.subr.bf16.mxu1 %v4110_v18  ;;  %v975_v18 = vsub.s32 2, %v4784_v48 }
 0x141   :  { %2635 = vmatpush1.bf16.msra.mxu0 %v4081_v4  ;;  %v4804_v4 = vsub.s32 0, %v4784_v48 }
 0x142   :  { %2636 = vmatprep.subr.bf16.mxu0 %v4089_v6  ;;  %2608 = vmatpush2.bf16.msra.mxu1 %v4108_v20 }
 0x143   :  { %2609 = vmatprep.subr.bf16.mxu1 %v4116_v22 }
 0x145   :  { %2637 = vmatpush1.bf16.msra.mxu0 %v4087_v8 }
 0x146   :  { %2638 = vmatprep.subr.bf16.mxu0 %v4095_v10  ;;  %2610 = vmatpush2.bf16.msra.mxu1 %v4114_v25  ;;  %v968_v10 = vrot.slane %v4790_v51, %v4804_v4 }
 0x147   :  { %2611 = vmatprep.subr.bf16.mxu1 %v4122_v29 }
 0x149   :  { %2639 = vmatpush1.bf16.msra.mxu0 %v4093_v13 }
 0x14a   :  { %2640 = vmatprep.subr.bf16.mxu0 %v4101_v15  ;;  %2612 = vmatpush2.bf16.msra.mxu1 %v4120_v30 }
 0x14b   :  { %2613 = vmatprep.subr.bf16.mxu1 %v4128_v32 }
 0x14d   :  { %2641 = vmatpush1.bf16.msra.mxu0 %v4099_v17 }
 0x14e   :  { %2642 = vmatprep.subr.bf16.mxu0 %v4107_v19  ;;  %2614 = vmatpush2.bf16.msra.mxu1 %v4126_v33  ;;  %v4155_v33 = vld [vmem:[#allocation4 + $0x4c4] ss:$16 sps:$4 sm:$0xff]  }
 0x14f   :  { %2615 = vmatprep.subr.bf16.mxu1 %v4134_v36 }
 0x151   :  { %2643 = vmatpush1.bf16.msra.mxu0 %v4105_v21  ;;  %v979_v21 = vsub.s32 3, %v4784_v48 }
 0x152   :  { %2644 = vmatprep.subr.bf16.mxu0 %v4113_v24  ;;  %2616 = vmatpush2.bf16.msra.mxu1 %v4132_v37 }
 0x153   :  { %2617 = vmatprep.subr.bf16.mxu1 %v4140_v40  ;;  %v980_v30 = vrot.slane %v4790_v51, %v979_v21 }
 0x155   :  { %2645 = vmatpush2.bf16.msra.mxu0 %v4111_v26  ;;  %v976_v26 = vrot.slane %v4790_v51, %v975_v18 }
 0x156   :  { %2646 = vmatprep.subr.bf16.mxu0 %v4119_v27  ;;  %2618 = vmatpush2.bf16.msra.mxu1 %v4138_v41 }
 0x157   :  { %2669 = vmatprep.subr.bf16.mxu1 %v4149_v44 }
 0x159   :  { %2647 = vmatpush2.bf16.msra.mxu0 %v4117_v28 }
 0x15a   :  { %2648 = vmatprep.subr.bf16.mxu0 %v4125_v31  ;;  %v4147_v31 = vld [vmem:[#allocation4 + $0x4e0] ss:$16 sps:$4 sm:$0xff]  }
 0x15d   :  { %2649 = vmatpush2.bf16.msra.mxu0 %v4123_v23 }
 0x15e   :  { %2650 = vmatprep.subr.bf16.mxu0 %v4131_v34 }
 0x161   :  { %2651 = vmatpush2.bf16.msra.mxu0 %v4129_v35 }
 0x162   :  { %2652 = vmatprep.subr.bf16.mxu0 %v4137_v38  ;;  %v4153_v38 = vld [vmem:[#allocation4 + $0x4c0] ss:$16 sps:$4 sm:$0xff]  }
 0x165   :  { %2653 = vmatpush2.bf16.msra.mxu0 %v4135_v39  ;;  %v987_v39 = vsub.s32 5, %v4784_v48 }
 0x166   :  { %2654 = vmatprep.subr.bf16.mxu0 %v4143_v42  ;;  %v4158_v42 = vld [vmem:[#allocation4 + $0x4a4] ss:$16 sps:$4 sm:$0xff]  }
 0x169   :  { %2655 = vmatpush2.bf16.msra.mxu0 %v4141_v43 }
 0x16a   :  { %2656 = vmatprep.subr.bf16.mxu0 %v4146_v46 }
 0x16d   :  { %2657 = vmatpush2.bf16.msra.mxu0 %v4144_v47  ;;  %v988_v47 = vrot.slane %v4790_v51, %v987_v39  ;;  %v4203_v39 = vld [vmem:[#allocation4 + $0x604] ss:$16 sps:$4 sm:$0xff]  }
 0x16e   :  { %2658 = vmatprep.subr.bf16.mxu0 %v4152_v49  ;;  %v4156_v49 = vld [vmem:[#allocation4 + $0x4a0] ss:$16 sps:$4 sm:$0xff]  }
 0x171   :  { %2659 = vmatpush2.bf16.msra.mxu0 %v4150_v52 }
 0x172   :  { %2710 = vmatprep.subr.bf16.mxu0 %v4161_v54 }
 0x1b4   :  { %v585_v57 = vpop.f32.mrf.mxu1  ;;  %v626_v58 = vpop.f32.mrf.mxu0 }
 0x1b6   :  { %v587_v59 = vpop.f32.mrf.mxu1  ;;  %v628_v60 = vpop.f32.mrf.mxu0 }
 0x1b8   :  { %v589_v61 = vpop.f32.mrf.mxu1  ;;  %v630_v62 = vpop.f32.mrf.mxu0 }
 0x1b9   :  { %v4162_v62 = vld [vmem:[#allocation4 + $0x480] ss:$16 sps:$4 sm:$0xff]  }
 0x1ba   :  { %v590_v63 = vpop.f32.mrf.mxu1  ;;  %v631_v0 = vpop.f32.mrf.mxu0 }
 0x1bb   :  { %v4165_v63 = vld [vmem:[#allocation4 + $0x6c0] ss:$16 sps:$4 sm:$0xff]   ;;  %v995_v0 = vsub.s32 7, %v4784_v48 }
 0x1d4   :  { %v667_v12 = vpop.f32.mrf.mxu1  ;;  %v4799_v1 = vpop.f32.mrf.mxu0 }
 0x1d6   :  { %v669_v2 = vpop.f32.mrf.mxu1  ;;  %v4801_v3 = vpop.f32.mrf.mxu0 }
 0x1d8   :  { %v671_v5 = vpop.f32.mrf.mxu1  ;;  %v712_v6 = vpop.f32.mrf.mxu0 }
 0x1d9   :  { %v4170_v5 = vld [vmem:[#allocation4 + $0x464] ss:$16 sps:$4 sm:$0xff]  }
 0x1da   :  { %v672_v8 = vpop.f32.mrf.mxu1  ;;  %v713_v9 = vpop.f32.mrf.mxu0  ;;  %v4173_v6 = vld [vmem:[#allocation4 + $0x6a4] ss:$16 sps:$4 sm:$0xff]  }
 0x1dc   :  { %v833_v11 = vpop.f32.mrf.mxu0 }
 0x1dd   :  { %v834_v13 = vadd.f32 %v833_v11, %v585_v57  ;;  %v4167_v57 = vld [vmem:[#allocation4 + $0x6c4] ss:$16 sps:$4 sm:$0xff]   ;;  %v4168_v11 = vld [vmem:[#allocation4 + $0x460] ss:$16 sps:$4 sm:$0xff]  }
 0x1de   :  { %v835_v15 = vpop.f32.mrf.mxu0 }
 0x1df   :  { %v1005_v16 = vadd.f32 %v968_v10, %v834_v13  ;;  %v836_v17 = vadd.f32 %v835_v15, %v587_v59  ;;  %v996_v10 = vrot.slane %v4790_v51, %v995_v0  ;;  %v4171_v13 = vld [vmem:[#allocation4 + $0x6a0] ss:$16 sps:$4 sm:$0xff]   ;;  %v4176_v15 = vld [vmem:[#allocation4 + $0x444] ss:$16 sps:$4 sm:$0xff]  }
 0x1e0   :  { %v837_v19 = vpop.f32.mrf.mxu0  ;;  %v4177_v51 = vld [vmem:[#allocation4 + $0x680] ss:$16 sps:$4 sm:$0xff]  }
 0x1e1   :  { %v1006_v20 = vadd.f32 %v972_v14, %v836_v17  ;;  %v1013_v22 = vmax.f32 %v1005_v16, 0.0  ;;  %v4179_v16 = vld [vmem:[#allocation4 + $0x684] ss:$16 sps:$4 sm:$0xff]   ;;  %v4225_v0 = vld [vmem:[#allocation4 + $0x780] ss:$16 sps:$4 sm:$0xff]  }
 0x1e2   :  { %v838_v24 = vpop.f32.mrf.mxu0 }
 0x1e3   :  { %v1014_v25 = vmax.f32 %v1006_v20, 0.0  ;;  %v4823_v23 = vpack.c.bf16 %v1013_v22, %v1013_v22  ;;  %v4174_v22 = vld [vmem:[#allocation4 + $0x440] ss:$16 sps:$4 sm:$0xff]   ;;  %v4182_v24 = vld [vmem:[#allocation4 + $0x424] ss:$16 sps:$4 sm:$0xff]  }
 0x1e4   :  { %v874_v27 = vpop.f32.mrf.mxu0 }
 0x1e5   :  { %v4818_v28 = vpack.c.bf16 %v1014_v25, %v1014_v25  ;;  %v875_v29 = vadd.f32 %v874_v27, %v626_v58  ;;  %v4185_v25 = vld [vmem:[#allocation4 + $0x664] ss:$16 sps:$4 sm:$0xff]  }
 0x1e6   :  { %v876_v32 = vpop.f32.mrf.mxu0 }
 0x1e7   :  { %v1007_v34 = vadd.f32 %v976_v26, %v875_v29  ;;  %v877_v35 = vadd.f32 %v876_v32, %v628_v60  ;;  %2619 = vmatprep.mubr.bf16.mxu1 %v4818_v28  ;;  %v4186_v32 = vld [vmem:[#allocation4 + $0x400] ss:$16 sps:$4 sm:$0xff]  }
 0x1e8   :  { %v878_v36 = vpop.f32.mrf.mxu0  ;;  %2620 = vmatmul.mubr.bf16.vlgmr.msra.gmra.mxu1 %v4823_v23 }
 0x1e9   :  { %v1008_v37 = vadd.f32 %v980_v30, %v877_v35  ;;  %2670 = vmatpush1.bf16.msra.mxu1 %v4147_v31  ;;  %v1015_v40 = vmax.f32 %v1007_v34, 0.0  ;;  %v4188_v30 = vld [vmem:[#allocation4 + $0x404] ss:$16 sps:$4 sm:$0xff]   ;;  %v4192_v36 = vld [vmem:[#allocation4 + $0x5e0] ss:$16 sps:$4 sm:$0xff]  }
 0x1ea   :  { %v879_v41 = vpop.f32.mrf.mxu0  ;;  %2671 = vmatprep.subr.bf16.mxu1 %v4155_v33  ;;  %v4191_v31 = vld [vmem:[#allocation4 + $0x644] ss:$16 sps:$4 sm:$0xff]   ;;  %v4189_v33 = vld [vmem:[#allocation4 + $0x640] ss:$16 sps:$4 sm:$0xff]  }
 0x1eb   :  { %v1016_v43 = vmax.f32 %v1008_v37, 0.0  ;;  %v4831_v52 = vpack.c.bf16 %v1015_v40, %v1015_v40  ;;  %v4194_v34 = vld [vmem:[#allocation4 + $0x5e4] ss:$16 sps:$4 sm:$0xff]   ;;  %v4195_v37 = vld [vmem:[#allocation4 + $0x620] ss:$16 sps:$4 sm:$0xff]  }
 0x1ec   :  { %v915_v44 = vpop.f32.mrf.mxu0  ;;  %v4197_v35 = vld [vmem:[#allocation4 + $0x624] ss:$16 sps:$4 sm:$0xff]   ;;  %v4198_v40 = vld [vmem:[#allocation4 + $0x5c0] ss:$16 sps:$4 sm:$0xff]  }
 0x1ed   :  { %v4828_v45 = vpack.c.bf16 %v1016_v43, %v1016_v43  ;;  %v916_v46 = vadd.f32 %v915_v44, %v667_v12  ;;  %2672 = vmatpush1.bf16.msra.mxu1 %v4153_v38  ;;  %v4200_v38 = vld [vmem:[#allocation4 + $0x5c4] ss:$16 sps:$4 sm:$0xff]   ;;  %v4201_v41 = vld [vmem:[#allocation4 + $0x600] ss:$16 sps:$4 sm:$0xff]  }
 0x1ee   :  { %v917_v54 = vpop.f32.mrf.mxu0  ;;  %2673 = vmatprep.subr.bf16.mxu1 %v4158_v42  ;;  %v4206_v42 = vld [vmem:[#allocation4 + $0x5a4] ss:$16 sps:$4 sm:$0xff]   ;;  %v4204_v44 = vld [vmem:[#allocation4 + $0x5a0] ss:$16 sps:$4 sm:$0xff]  }
 0x1ef   :  { %v4834_v58 = vadd.f32 %v4793_v53, %v916_v46  ;;  %v918_v59 = vadd.f32 %v917_v54, %v669_v2  ;;  %2660 = vmatprep.mubr.bf16.mxu0 %v4828_v45  ;;  %v4209_v43 = vld [vmem:[#allocation4 + $0x7e4] ss:$16 sps:$4 sm:$0xff]   ;;  %v4207_v46 = vld [vmem:[#allocation4 + $0x7e0] ss:$16 sps:$4 sm:$0xff]  }
 0x1f0   :  { %v919_v60 = vpop.f32.mrf.mxu0  ;;  %2661 = vmatmul.mubr.bf16.vlgmr.msra.gmra.mxu0 %v4831_v52  ;;  %v4213_v54 = vld [vmem:[#allocation4 + $0x7c0] ss:$16 sps:$4 sm:$0xff]  }
 0x1f1   :  { %v1010_v61 = vadd.f32 %v988_v47, %v918_v59  ;;  %2674 = vmatpush1.bf16.msra.mxu1 %v4156_v49  ;;  %2711 = vmatpush1.bf16.msra.mxu0 %v4159_v50  ;;  %v4212_v47 = vld [vmem:[#allocation4 + $0x584] ss:$16 sps:$4 sm:$0xff]   ;;  %v4210_v50 = vld [vmem:[#allocation4 + $0x580] ss:$16 sps:$4 sm:$0xff]  }
 0x1f2   :  { %v920_v12 = vpop.f32.mrf.mxu0  ;;  %2675 = vmatprep.subr.bf16.mxu1 %v4164_v55  ;;  %2712 = vmatprep.subr.bf16.mxu0 %v4167_v57  ;;  %v4215_v49 = vld [vmem:[#allocation4 + $0x7c4] ss:$16 sps:$4 sm:$0xff]   ;;  %v4216_v59 = vld [vmem:[#allocation4 + $0x560] ss:$16 sps:$4 sm:$0xff]  }
 0x1f3   :  { %v1018_v53 = vmax.f32 %v1010_v61, 0.0  ;;  %v4218_v55 = vld [vmem:[#allocation4 + $0x564] ss:$16 sps:$4 sm:$0xff]   ;;  %v4219_v60 = vld [vmem:[#allocation4 + $0x7a0] ss:$16 sps:$4 sm:$0xff]  }
 0x1f4   :  { %v956_v8 = vpop.f32.mrf.mxu0  ;;  %v4221_v57 = vld [vmem:[#allocation4 + $0x7a4] ss:$16 sps:$4 sm:$0xff]  }
 0x1f5   :  { %v4839_v2 = vpack.c.bf16 %v1018_v53, %v1018_v53  ;;  %v957_v9 = vadd.f32 %v956_v8, %v4799_v1  ;;  %2676 = vmatpush1.bf16.msra.mxu1 %v4162_v62  ;;  %2713 = vmatpush1.bf16.msra.mxu0 %v4165_v63  ;;  %v4224_v61 = vld [vmem:[#allocation4 + $0x544] ss:$16 sps:$4 sm:$0xff]   ;;  %v4222_v63 = vld [vmem:[#allocation4 + $0x540] ss:$16 sps:$4 sm:$0xff]  }
 0x1f6   :  { %v958_v14 = vpop.f32.mrf.mxu0  ;;  %2677 = vmatprep.subr.bf16.mxu1 %v4170_v5  ;;  %2714 = vmatprep.subr.bf16.mxu0 %v4173_v6  ;;  %v4227_v62 = vld [vmem:[#allocation4 + $0x784] ss:$16 sps:$4 sm:$0xff]   ;;  %v4228_v6 = vld [vmem:[#allocation4 + $0x520] ss:$16 sps:$4 sm:$0xff]  }
 0x1f7   :  { %v4844_v17 = vadd.f32 %v4797_v56, %v957_v9  ;;  %v959_v19 = vadd.f32 %v958_v14, %v4801_v3  ;;  %2701 = vmatprep.mubr.bf16.mxu1 %v4839_v2  ;;  %v4180_v56 = vld [vmem:[#allocation4 + $0x420] ss:$16 sps:$4 sm:$0xff]   ;;  %v4230_v12 = vld [vmem:[#allocation4 + $0x524] ss:$16 sps:$4 sm:$0xff]  }
 0x1f8   :  { %v960_v20 = vpop.f32.mrf.mxu0  ;;  %v4183_v3 = vld [vmem:[#allocation4 + $0x660] ss:$16 sps:$4 sm:$0xff]   ;;  %v4233_v5 = vld [vmem:[#allocation4 + $0x764] ss:$16 sps:$4 sm:$0xff]  }
 0x1f9   :  { %v1012_v1 = vadd.f32 %v996_v10, %v959_v19  ;;  %2678 = vmatpush1.bf16.msra.mxu1 %v4168_v11  ;;  %2715 = vmatpush1.bf16.msra.mxu0 %v4171_v13  ;;  %v4231_v53 = vld [vmem:[#allocation4 + $0x760] ss:$16 sps:$4 sm:$0xff]   ;;  %v4236_v8 = vld [vmem:[#allocation4 + $0x504] ss:$16 sps:$4 sm:$0xff]   ;;  %v1017_v13 = vmax.f32 %v4834_v58, 0.0 }
 0x1fa   :  { %2679 = vmatprep.subr.bf16.mxu1 %v4176_v15  ;;  %2716 = vmatprep.subr.bf16.mxu0 %v4179_v16  ;;  %v961_v26 = vpop.f32.mrf.mxu0  ;;  %v4239_v9 = vld [vmem:[#allocation4 + $0x744] ss:$16 sps:$4 sm:$0xff]   ;;  %v4234_v10 = vld [vmem:[#allocation4 + $0x500] ss:$16 sps:$4 sm:$0xff]   ;;  %v4245_v15 = vld [vmem:[#allocation4 + $0xec] ss:$16 sps:$4 sm:$0xff]  }
 0x1fb   :  { %v1020_v27 = vmax.f32 %v1012_v1, 0.0  ;;  %v4237_v11 = vld [vmem:[#allocation4 + $0x740] ss:$16 sps:$4 sm:$0xff]   ;;  %v4242_v14 = vld [vmem:[#allocation4 + $0x724] ss:$16 sps:$4 sm:$0xff]   ;;  %v4852_v20 = vpack.c.bf16 %v1017_v13, %v1017_v13 }
 0x1fc   :  { %v4240_v16 = vld [vmem:[#allocation4 + $0x720] ss:$16 sps:$4 sm:$0xff]   ;;  %v4243_v19 = vld [vmem:[#allocation4 + $0xe8] ss:$16 sps:$4 sm:$0xff]   ;;  %v4248_v1 = vld [vmem:[#allocation4 + $0x704] ss:$16 sps:$4 sm:$0xff]  }
 0x1fd   :  { %v4848_v29 = vpack.c.bf16 %v1020_v27, %v1020_v27  ;;  %2680 = vmatpush1.bf16.msra.mxu1 %v4174_v22  ;;  %2717 = vmatpush1.bf16.msra.mxu0 %v4177_v51  ;;  %v4251_v22 = vld [vmem:[#allocation4 + $0xcc] ss:$16 sps:$4 sm:$0xff]   ;;  %v4246_v51 = vld [vmem:[#allocation4 + $0x700] ss:$16 sps:$4 sm:$0xff]   ;;  %v4249_v58 = vld [vmem:[#allocation4 + $0xc8] ss:$16 sps:$4 sm:$0xff]  }
 0x1fe   :  { %2681 = vmatprep.subr.bf16.mxu1 %v4182_v24  ;;  %2718 = vmatprep.subr.bf16.mxu0 %v4185_v25  ;;  %v1019_v24 = vmax.f32 %v4844_v17, 0.0  ;;  %v4254_v25 = vld [vmem:[#allocation4 + $0xac] ss:$16 sps:$4 sm:$0xff]   ;;  %v4252_v27 = vld [vmem:[#allocation4 + $0xa8] ss:$16 sps:$4 sm:$0xff]  }
 0x1ff   :  { %2742 = vmatprep.mubr.bf16.mxu0 %v4848_v29  ;;  %v4257_v26 = vld [vmem:[#allocation4 + $0x2ec] ss:$16 sps:$4 sm:$0xff]   ;;  %v4258_v17 = vld [vmem:[#allocation4 + $0x88] ss:$16 sps:$4 sm:$0xff]  }
 0x200   :  { %v4315_v13 = vld [vmem:[#allocation4 + $0x3a8] ss:$16 sps:$4 sm:$0xff]  }
 0x201   :  { %2682 = vmatpush1.bf16.msra.mxu1 %v4180_v56  ;;  %2719 = vmatpush1.bf16.msra.mxu0 %v4183_v3  ;;  %v4255_v56 = vld [vmem:[#allocation4 + $0x2e8] ss:$16 sps:$4 sm:$0xff]   ;;  %v4857_v3 = vpack.c.bf16 %v1019_v24, %v1019_v24  ;;  %v4332_v24 = vld [vmem:[#allocation4 + $0x10c] ss:$16 sps:$4 sm:$0xff]  }
 0x202   :  { %2683 = vmatprep.subr.bf16.mxu1 %v4188_v30  ;;  %2720 = vmatprep.subr.bf16.mxu0 %v4191_v31  ;;  %v4260_v30 = vld [vmem:[#allocation4 + $0x8c] ss:$16 sps:$4 sm:$0xff]  }
 0x203   :  { %v4263_v31 = vld [vmem:[#allocation4 + $0x2cc] ss:$16 sps:$4 sm:$0xff]  }
 0x205   :  { %2684 = vmatpush1.bf16.msra.mxu1 %v4186_v32  ;;  %2721 = vmatpush1.bf16.msra.mxu0 %v4189_v33  ;;  %v4266_v32 = vld [vmem:[#allocation4 + $0x6c] ss:$16 sps:$4 sm:$0xff]  }
 0x206   :  { %2685 = vmatprep.subr.bf16.mxu1 %v4194_v34  ;;  %2722 = vmatprep.subr.bf16.mxu0 %v4197_v35  ;;  %v4269_v33 = vld [vmem:[#allocation4 + $0x2ac] ss:$16 sps:$4 sm:$0xff]   ;;  %v4264_v34 = vld [vmem:[#allocation4 + $0x68] ss:$16 sps:$4 sm:$0xff]  }
 0x207   :  { %v4267_v35 = vld [vmem:[#allocation4 + $0x2a8] ss:$16 sps:$4 sm:$0xff]  }
 0x209   :  { %2686 = vmatpush2.bf16.msra.mxu1 %v4192_v36  ;;  %2723 = vmatpush1.bf16.msra.mxu0 %v4195_v37  ;;  %v4272_v36 = vld [vmem:[#allocation4 + $0x4c] ss:$16 sps:$4 sm:$0xff]  }
 0x20a   :  { %2687 = vmatprep.subr.bf16.mxu1 %v4200_v38  ;;  %2724 = vmatprep.subr.bf16.mxu0 %v4203_v39  ;;  %v4275_v37 = vld [vmem:[#allocation4 + $0x28c] ss:$16 sps:$4 sm:$0xff]   ;;  %v4270_v38 = vld [vmem:[#allocation4 + $0x48] ss:$16 sps:$4 sm:$0xff]  }
 0x20b   :  { %v4273_v39 = vld [vmem:[#allocation4 + $0x288] ss:$16 sps:$4 sm:$0xff]  }
 0x20d   :  { %2688 = vmatpush2.bf16.msra.mxu1 %v4198_v40  ;;  %2725 = vmatpush1.bf16.msra.mxu0 %v4201_v41  ;;  %v4278_v40 = vld [vmem:[#allocation4 + $0x2c] ss:$16 sps:$4 sm:$0xff]   ;;  %v4276_v41 = vld [vmem:[#allocation4 + $0x28] ss:$16 sps:$4 sm:$0xff]  }
 0x20e   :  { %2689 = vmatprep.subr.bf16.mxu1 %v4206_v42  ;;  %2726 = vmatprep.subr.bf16.mxu0 %v4209_v43  ;;  %v4279_v42 = vld [vmem:[#allocation4 + $0x268] ss:$16 sps:$4 sm:$0xff]   ;;  %v4284_v43 = vld [vmem:[#allocation4 + $0xc] ss:$16 sps:$4 sm:$0xff]  }
 0x211   :  { %2690 = vmatpush2.bf16.msra.mxu1 %v4204_v44  ;;  %2727 = vmatpush2.bf16.msra.mxu0 %v4207_v46  ;;  %v4287_v44 = vld [vmem:[#allocation4 + $0x24c] ss:$16 sps:$4 sm:$0xff]   ;;  %v4282_v46 = vld [vmem:[#allocation4 + $0x8] ss:$16 sps:$4 sm:$0xff]  }
 0x212   :  { %2691 = vmatprep.subr.bf16.mxu1 %v4212_v47  ;;  %2728 = vmatprep.subr.bf16.mxu0 %v4215_v49  ;;  %v4285_v47 = vld [vmem:[#allocation4 + $0x248] ss:$16 sps:$4 sm:$0xff]   ;;  %v4290_v49 = vld [vmem:[#allocation4 + $0x1ec] ss:$16 sps:$4 sm:$0xff]  }
 0x215   :  { %2692 = vmatpush2.bf16.msra.mxu1 %v4210_v50  ;;  %2729 = vmatpush2.bf16.msra.mxu0 %v4213_v54  ;;  %v4293_v50 = vld [vmem:[#allocation4 + $0x22c] ss:$16 sps:$4 sm:$0xff]   ;;  %v4288_v54 = vld [vmem:[#allocation4 + $0x1e8] ss:$16 sps:$4 sm:$0xff]  }
 0x216   :  { %2693 = vmatprep.subr.bf16.mxu1 %v4218_v55  ;;  %2730 = vmatprep.subr.bf16.mxu0 %v4221_v57  ;;  %v4291_v55 = vld [vmem:[#allocation4 + $0x228] ss:$16 sps:$4 sm:$0xff]   ;;  %v4296_v57 = vld [vmem:[#allocation4 + $0x1cc] ss:$16 sps:$4 sm:$0xff]  }
 0x219   :  { %2694 = vmatpush2.bf16.msra.mxu1 %v4216_v59  ;;  %2731 = vmatpush2.bf16.msra.mxu0 %v4219_v60  ;;  %v4299_v59 = vld [vmem:[#allocation4 + $0x20c] ss:$16 sps:$4 sm:$0xff]   ;;  %v4294_v60 = vld [vmem:[#allocation4 + $0x1c8] ss:$16 sps:$4 sm:$0xff]  }
 0x21a   :  { %2695 = vmatprep.subr.bf16.mxu1 %v4224_v61  ;;  %2732 = vmatprep.subr.bf16.mxu0 %v4227_v62  ;;  %v4297_v61 = vld [vmem:[#allocation4 + $0x208] ss:$16 sps:$4 sm:$0xff]   ;;  %v4302_v62 = vld [vmem:[#allocation4 + $0x1ac] ss:$16 sps:$4 sm:$0xff]  }
 0x21d   :  { %2696 = vmatpush2.bf16.msra.mxu1 %v4222_v63  ;;  %2733 = vmatpush2.bf16.msra.mxu0 %v4225_v0  ;;  %v4305_v63 = vld [vmem:[#allocation4 + $0x3ec] ss:$16 sps:$4 sm:$0xff]   ;;  %v4300_v0 = vld [vmem:[#allocation4 + $0x1a8] ss:$16 sps:$4 sm:$0xff]  }
 0x21e   :  { %2697 = vmatprep.subr.bf16.mxu1 %v4230_v12  ;;  %2734 = vmatprep.subr.bf16.mxu0 %v4233_v5  ;;  %v4303_v12 = vld [vmem:[#allocation4 + $0x3e8] ss:$16 sps:$4 sm:$0xff]   ;;  %v4308_v5 = vld [vmem:[#allocation4 + $0x18c] ss:$16 sps:$4 sm:$0xff]  }
 0x221   :  { %2698 = vmatpush2.bf16.msra.mxu1 %v4228_v6  ;;  %2735 = vmatpush2.bf16.msra.mxu0 %v4231_v53  ;;  %v4311_v6 = vld [vmem:[#allocation4 + $0x3cc] ss:$16 sps:$4 sm:$0xff]   ;;  %v4306_v53 = vld [vmem:[#allocation4 + $0x188] ss:$16 sps:$4 sm:$0xff]  }
 0x222   :  { %2699 = vmatprep.subr.bf16.mxu1 %v4236_v8  ;;  %2736 = vmatprep.subr.bf16.mxu0 %v4239_v9  ;;  %v4309_v8 = vld [vmem:[#allocation4 + $0x3c8] ss:$16 sps:$4 sm:$0xff]   ;;  %v4314_v9 = vld [vmem:[#allocation4 + $0x16c] ss:$16 sps:$4 sm:$0xff]  }
 0x225   :  { %2700 = vmatpush2.bf16.msra.mxu1 %v4234_v10  ;;  %2737 = vmatpush2.bf16.msra.mxu0 %v4237_v11  ;;  %v4317_v10 = vld [vmem:[#allocation4 + $0x3ac] ss:$16 sps:$4 sm:$0xff]   ;;  %v4312_v11 = vld [vmem:[#allocation4 + $0x168] ss:$16 sps:$4 sm:$0xff]  }
 0x226   :  { %2738 = vmatprep.subr.bf16.mxu0 %v4242_v14  ;;  %2751 = vmatprep.subr.bf16.mxu1 %v4245_v15  ;;  %v4320_v14 = vld [vmem:[#allocation4 + $0x14c] ss:$16 sps:$4 sm:$0xff]  }
 0x227   :  { %v4323_v15 = vld [vmem:[#allocation4 + $0x38c] ss:$16 sps:$4 sm:$0xff]  }
 0x228   :  { %2702 = vmatmul.mubr.bf16.vlgmr.msra.gmra.mxu1 %v4852_v20 }
 0x229   :  { %2739 = vmatpush2.bf16.msra.mxu0 %v4240_v16  ;;  %2752 = vmatpush1.bf16.msra.mxu1 %v4243_v19  ;;  %v4318_v16 = vld [vmem:[#allocation4 + $0x148] ss:$16 sps:$4 sm:$0xff]  }
 0x22a   :  { %2783 = vmatprep.mubr.bf16.mxu1 %v4818_v28  ;;  %2740 = vmatprep.subr.bf16.mxu0 %v4248_v1  ;;  %v4261_v28 = vld [vmem:[#allocation4 + $0x2c8] ss:$16 sps:$4 sm:$0xff]   ;;  %v4326_v1 = vld [vmem:[#allocation4 + $0x12c] ss:$16 sps:$4 sm:$0xff]  }
 0x22b   :  { %2753 = vmatprep.subr.bf16.mxu1 %v4251_v22  ;;  %v4321_v19 = vld [vmem:[#allocation4 + $0x388] ss:$16 sps:$4 sm:$0xff]   ;;  %v4329_v22 = vld [vmem:[#allocation4 + $0x36c] ss:$16 sps:$4 sm:$0xff]  }
 0x22d   :  { %2741 = vmatpush2.bf16.msra.mxu0 %v4246_v51  ;;  %2754 = vmatpush1.bf16.msra.mxu1 %v4249_v58  ;;  %v4324_v51 = vld [vmem:[#allocation4 + $0x128] ss:$16 sps:$4 sm:$0xff]  }
 0x22e   :  { %2755 = vmatprep.subr.bf16.mxu1 %v4254_v25  ;;  %2792 = vmatprep.subr.bf16.mxu0 %v4257_v26  ;;  %v4327_v58 = vld [vmem:[#allocation4 + $0x368] ss:$16 sps:$4 sm:$0xff]   ;;  %v4335_v25 = vld [vmem:[#allocation4 + $0x34c] ss:$16 sps:$4 sm:$0xff]  }
 0x22f   :  { %v4330_v26 = vld [vmem:[#allocation4 + $0x108] ss:$16 sps:$4 sm:$0xff]  }
 0x230   :  { %2743 = vmatmul.mubr.bf16.vlgmr.msra.gmra.mxu0 %v4857_v3 }
 0x231   :  { %2756 = vmatpush1.bf16.msra.mxu1 %v4252_v27  ;;  %2793 = vmatpush1.bf16.msra.mxu0 %v4255_v56  ;;  %v4333_v27 = vld [vmem:[#allocation4 + $0x348] ss:$16 sps:$4 sm:$0xff]   ;;  %v4338_v56 = vld [vmem:[#allocation4 + $0x32c] ss:$16 sps:$4 sm:$0xff]  }
 0x232   :  { %2824 = vmatprep.mubr.bf16.mxu0 %v4828_v45  ;;  %2757 = vmatprep.subr.bf16.mxu1 %v4260_v30  ;;  %v4281_v45 = vld [vmem:[#allocation4 + $0x26c] ss:$16 sps:$4 sm:$0xff]  }
 0x233   :  { %2794 = vmatprep.subr.bf16.mxu0 %v4263_v31  ;;  %v4341_v30 = vld [vmem:[#allocation4 + $0x4ec] ss:$16 sps:$4 sm:$0xff]   ;;  %v4336_v31 = vld [vmem:[#allocation4 + $0x328] ss:$16 sps:$4 sm:$0xff]  }
 0x235   :  { %2758 = vmatpush1.bf16.msra.mxu1 %v4258_v17  ;;  %2795 = vmatpush1.bf16.msra.mxu0 %v4261_v28  ;;  %v4339_v17 = vld [vmem:[#allocation4 + $0x4e8] ss:$16 sps:$4 sm:$0xff]   ;;  %v4344_v28 = vld [vmem:[#allocation4 + $0x30c] ss:$16 sps:$4 sm:$0xff]  }
 0x236   :  { %2759 = vmatprep.subr.bf16.mxu1 %v4266_v32  ;;  %2796 = vmatprep.subr.bf16.mxu0 %v4269_v33  ;;  %v4347_v32 = vld [vmem:[#allocation4 + $0x4cc] ss:$16 sps:$4 sm:$0xff]   ;;  %v4342_v33 = vld [vmem:[#allocation4 + $0x308] ss:$16 sps:$4 sm:$0xff]  }
 0x239   :  { %2760 = vmatpush1.bf16.msra.mxu1 %v4264_v34  ;;  %2797 = vmatpush1.bf16.msra.mxu0 %v4267_v35  ;;  %v4345_v34 = vld [vmem:[#allocation4 + $0x4c8] ss:$16 sps:$4 sm:$0xff]   ;;  %v4350_v35 = vld [vmem:[#allocation4 + $0x4ac] ss:$16 sps:$4 sm:$0xff]  }
 0x23a   :  { %2761 = vmatprep.subr.bf16.mxu1 %v4272_v36  ;;  %2798 = vmatprep.subr.bf16.mxu0 %v4275_v37  ;;  %v4353_v36 = vld [vmem:[#allocation4 + $0x6ec] ss:$16 sps:$4 sm:$0xff]   ;;  %v4348_v37 = vld [vmem:[#allocation4 + $0x4a8] ss:$16 sps:$4 sm:$0xff]  }
 0x23d   :  { %2762 = vmatpush1.bf16.msra.mxu1 %v4270_v38  ;;  %2799 = vmatpush1.bf16.msra.mxu0 %v4273_v39  ;;  %v4351_v38 = vld [vmem:[#allocation4 + $0x6e8] ss:$16 sps:$4 sm:$0xff]   ;;  %v4356_v39 = vld [vmem:[#allocation4 + $0x48c] ss:$16 sps:$4 sm:$0xff]  }
 0x23e   :  { %2763 = vmatprep.subr.bf16.mxu1 %v4278_v40  ;;  %2800 = vmatprep.subr.bf16.mxu0 %v4281_v45  ;;  %v4359_v40 = vld [vmem:[#allocation4 + $0x6cc] ss:$16 sps:$4 sm:$0xff]   ;;  %v4357_v45 = vld [vmem:[#allocation4 + $0x6c8] ss:$16 sps:$4 sm:$0xff]  }
 0x241   :  { %2764 = vmatpush1.bf16.msra.mxu1 %v4276_v41  ;;  %2801 = vmatpush1.bf16.msra.mxu0 %v4279_v42  ;;  %v4365_v41 = vld [vmem:[#allocation4 + $0x6ac] ss:$16 sps:$4 sm:$0xff]   ;;  %v4360_v42 = vld [vmem:[#allocation4 + $0x468] ss:$16 sps:$4 sm:$0xff]  }
 0x242   :  { %2765 = vmatprep.subr.bf16.mxu1 %v4284_v43  ;;  %2802 = vmatprep.subr.bf16.mxu0 %v4287_v44  ;;  %v4363_v43 = vld [vmem:[#allocation4 + $0x6a8] ss:$16 sps:$4 sm:$0xff]   ;;  %v4368_v44 = vld [vmem:[#allocation4 + $0x44c] ss:$16 sps:$4 sm:$0xff]  }
 0x245   :  { %2766 = vmatpush1.bf16.msra.mxu1 %v4282_v46  ;;  %2803 = vmatpush1.bf16.msra.mxu0 %v4285_v47  ;;  %v4371_v46 = vld [vmem:[#allocation4 + $0x68c] ss:$16 sps:$4 sm:$0xff]   ;;  %v4369_v47 = vld [vmem:[#allocation4 + $0x688] ss:$16 sps:$4 sm:$0xff]  }
 0x246   :  { %2767 = vmatprep.subr.bf16.mxu1 %v4290_v49  ;;  %2804 = vmatprep.subr.bf16.mxu0 %v4293_v50  ;;  %v4374_v49 = vld [vmem:[#allocation4 + $0x42c] ss:$16 sps:$4 sm:$0xff]   ;;  %v4372_v50 = vld [vmem:[#allocation4 + $0x428] ss:$16 sps:$4 sm:$0xff]  }
 0x249   :  { %2768 = vmatpush2.bf16.msra.mxu1 %v4288_v54  ;;  %2805 = vmatpush1.bf16.msra.mxu0 %v4291_v55  ;;  %v4375_v54 = vld [vmem:[#allocation4 + $0x668] ss:$16 sps:$4 sm:$0xff]   ;;  %v4380_v55 = vld [vmem:[#allocation4 + $0x40c] ss:$16 sps:$4 sm:$0xff]  }
 0x24a   :  { %2769 = vmatprep.subr.bf16.mxu1 %v4296_v57  ;;  %2806 = vmatprep.subr.bf16.mxu0 %v4299_v59  ;;  %v4383_v57 = vld [vmem:[#allocation4 + $0x64c] ss:$16 sps:$4 sm:$0xff]   ;;  %v4378_v59 = vld [vmem:[#allocation4 + $0x408] ss:$16 sps:$4 sm:$0xff]  }
 0x24d   :  { %2770 = vmatpush2.bf16.msra.mxu1 %v4294_v60  ;;  %2807 = vmatpush1.bf16.msra.mxu0 %v4297_v61  ;;  %v4381_v60 = vld [vmem:[#allocation4 + $0x648] ss:$16 sps:$4 sm:$0xff]   ;;  %v4386_v61 = vld [vmem:[#allocation4 + $0x5ec] ss:$16 sps:$4 sm:$0xff]  }
 0x24e   :  { %2771 = vmatprep.subr.bf16.mxu1 %v4302_v62  ;;  %2808 = vmatprep.subr.bf16.mxu0 %v4305_v63  ;;  %v4389_v62 = vld [vmem:[#allocation4 + $0x62c] ss:$16 sps:$4 sm:$0xff]   ;;  %v4384_v63 = vld [vmem:[#allocation4 + $0x5e8] ss:$16 sps:$4 sm:$0xff]  }
 0x251   :  { %2772 = vmatpush2.bf16.msra.mxu1 %v4300_v0  ;;  %2809 = vmatpush2.bf16.msra.mxu0 %v4303_v12  ;;  %v4387_v0 = vld [vmem:[#allocation4 + $0x628] ss:$16 sps:$4 sm:$0xff]   ;;  %v4392_v12 = vld [vmem:[#allocation4 + $0x5cc] ss:$16 sps:$4 sm:$0xff]  }
 0x252   :  { %2773 = vmatprep.subr.bf16.mxu1 %v4308_v5  ;;  %2810 = vmatprep.subr.bf16.mxu0 %v4311_v6  ;;  %v4395_v5 = vld [vmem:[#allocation4 + $0x60c] ss:$16 sps:$4 sm:$0xff]   ;;  %v4390_v6 = vld [vmem:[#allocation4 + $0x5c8] ss:$16 sps:$4 sm:$0xff]  }
 0x255   :  { %2774 = vmatpush2.bf16.msra.mxu1 %v4306_v53  ;;  %2811 = vmatpush2.bf16.msra.mxu0 %v4309_v8  ;;  %v4393_v53 = vld [vmem:[#allocation4 + $0x608] ss:$16 sps:$4 sm:$0xff]   ;;  %v4398_v8 = vld [vmem:[#allocation4 + $0x5ac] ss:$16 sps:$4 sm:$0xff]  }
 0x256   :  { %2775 = vmatprep.subr.bf16.mxu1 %v4314_v9  ;;  %2812 = vmatprep.subr.bf16.mxu0 %v4317_v10  ;;  %v4401_v9 = vld [vmem:[#allocation4 + $0x7ec] ss:$16 sps:$4 sm:$0xff]   ;;  %v4396_v10 = vld [vmem:[#allocation4 + $0x5a8] ss:$16 sps:$4 sm:$0xff]  }
 0x259   :  { %2776 = vmatpush2.bf16.msra.mxu1 %v4312_v11  ;;  %2813 = vmatpush2.bf16.msra.mxu0 %v4315_v13  ;;  %v4399_v11 = vld [vmem:[#allocation4 + $0x7e8] ss:$16 sps:$4 sm:$0xff]   ;;  %v4404_v13 = vld [vmem:[#allocation4 + $0x58c] ss:$16 sps:$4 sm:$0xff]  }
 0x25a   :  { %2777 = vmatprep.subr.bf16.mxu1 %v4320_v14  ;;  %2814 = vmatprep.subr.bf16.mxu0 %v4323_v15  ;;  %v4407_v14 = vld [vmem:[#allocation4 + $0x7cc] ss:$16 sps:$4 sm:$0xff]   ;;  %v4402_v15 = vld [vmem:[#allocation4 + $0x588] ss:$16 sps:$4 sm:$0xff]  }
 0x25d   :  { %2778 = vmatpush2.bf16.msra.mxu1 %v4318_v16  ;;  %2815 = vmatpush2.bf16.msra.mxu0 %v4321_v19  ;;  %v4405_v16 = vld [vmem:[#allocation4 + $0x7c8] ss:$16 sps:$4 sm:$0xff]   ;;  %v4410_v19 = vld [vmem:[#allocation4 + $0x56c] ss:$16 sps:$4 sm:$0xff]  }
 0x25e   :  { %2779 = vmatprep.subr.bf16.mxu1 %v4326_v1  ;;  %2816 = vmatprep.subr.bf16.mxu0 %v4329_v22  ;;  %v4413_v1 = vld [vmem:[#allocation4 + $0x7ac] ss:$16 sps:$4 sm:$0xff]   ;;  %v4408_v22 = vld [vmem:[#allocation4 + $0x568] ss:$16 sps:$4 sm:$0xff]  }
 0x261   :  { %2780 = vmatpush2.bf16.msra.mxu1 %v4324_v51  ;;  %2817 = vmatpush2.bf16.msra.mxu0 %v4327_v58  ;;  %v4411_v51 = vld [vmem:[#allocation4 + $0x7a8] ss:$16 sps:$4 sm:$0xff]   ;;  %v4416_v58 = vld [vmem:[#allocation4 + $0x54c] ss:$16 sps:$4 sm:$0xff]  }
 0x262   :  { %2781 = vmatprep.subr.bf16.mxu1 %v4332_v24  ;;  %2818 = vmatprep.subr.bf16.mxu0 %v4335_v25  ;;  %v4419_v24 = vld [vmem:[#allocation4 + $0x78c] ss:$16 sps:$4 sm:$0xff]   ;;  %v4414_v25 = vld [vmem:[#allocation4 + $0x548] ss:$16 sps:$4 sm:$0xff]  }
 0x265   :  { %2782 = vmatpush2.bf16.msra.mxu1 %v4330_v26  ;;  %2819 = vmatpush2.bf16.msra.mxu0 %v4333_v27  ;;  %v4417_v26 = vld [vmem:[#allocation4 + $0x788] ss:$16 sps:$4 sm:$0xff]   ;;  %v4422_v27 = vld [vmem:[#allocation4 + $0x52c] ss:$16 sps:$4 sm:$0xff]  }
 0x266   :  { %2820 = vmatprep.subr.bf16.mxu0 %v4338_v56  ;;  %2833 = vmatprep.subr.bf16.mxu1 %v4341_v30  ;;  %v4425_v56 = vld [vmem:[#allocation4 + $0x76c] ss:$16 sps:$4 sm:$0xff]   ;;  %v4420_v30 = vld [vmem:[#allocation4 + $0x528] ss:$16 sps:$4 sm:$0xff]  }
 0x268   :  { %2784 = vmatmul.mubr.bf16.vlgmr.msra.gmra.mxu1 %v4823_v23  ;;  %v4354_v23 = vld [vmem:[#allocation4 + $0x488] ss:$16 sps:$4 sm:$0xff]  }
 0x269   :  { %2821 = vmatpush2.bf16.msra.mxu0 %v4336_v31  ;;  %2834 = vmatpush1.bf16.msra.mxu1 %v4339_v17  ;;  %v4423_v31 = vld [vmem:[#allocation4 + $0x768] ss:$16 sps:$4 sm:$0xff]   ;;  %v4428_v17 = vld [vmem:[#allocation4 + $0x50c] ss:$16 sps:$4 sm:$0xff]  }
 0x26a   :  { %2865 = vmatprep.mubr.bf16.mxu1 %v4839_v2  ;;  %2822 = vmatprep.subr.bf16.mxu0 %v4344_v28  ;;  %v4362_v2 = vld [vmem:[#allocation4 + $0x46c] ss:$16 sps:$4 sm:$0xff]  }
 0x26b   :  { %2835 = vmatprep.subr.bf16.mxu1 %v4347_v32  ;;  %v4431_v28 = vld [vmem:[#allocation4 + $0x74c] ss:$16 sps:$4 sm:$0xff]   ;;  %v4426_v32 = vld [vmem:[#allocation4 + $0x508] ss:$16 sps:$4 sm:$0xff]  }
 0x26d   :  { %2823 = vmatpush2.bf16.msra.mxu0 %v4342_v33  ;;  %2836 = vmatpush1.bf16.msra.mxu1 %v4345_v34  ;;  %v4429_v33 = vld [vmem:[#allocation4 + $0x748] ss:$16 sps:$4 sm:$0xff]   ;;  %v4434_v34 = vld [vmem:[#allocation4 + $0x72c] ss:$16 sps:$4 sm:$0xff]  }
 0x26e   :  { %2837 = vmatprep.subr.bf16.mxu1 %v4350_v35  ;;  %2874 = vmatprep.subr.bf16.mxu0 %v4353_v36  ;;  %v4440_v35 = vld [vmem:[#allocation6 + $0x74] ss:$8 sps:$4 sm:$0xff]   ;;  %v4432_v36 = vld [vmem:[#allocation4 + $0x728] ss:$16 sps:$4 sm:$0xff]  }
 0x270   :  { %2825 = vmatmul.mubr.bf16.vlgmr.msra.gmra.mxu0 %v4831_v52  ;;  %v4366_v52 = vld [vmem:[#allocation4 + $0x448] ss:$16 sps:$4 sm:$0xff]  }
 0x271   :  { %2838 = vmatpush1.bf16.msra.mxu1 %v4348_v37  ;;  %2875 = vmatpush1.bf16.msra.mxu0 %v4351_v38  ;;  %v4438_v37 = vld [vmem:[#allocation6 + $0x70] ss:$8 sps:$4 sm:$0xff]   ;;  %v4437_v38 = vld [vmem:[#allocation4 + $0x70c] ss:$16 sps:$4 sm:$0xff]  }
 0x272   :  { %2906 = vmatprep.mubr.bf16.mxu0 %v4848_v29  ;;  %2839 = vmatprep.subr.bf16.mxu1 %v4356_v39  ;;  %v4377_v29 = vld [vmem:[#allocation4 + $0x66c] ss:$16 sps:$4 sm:$0xff]  }
 0x273   :  { %2876 = vmatprep.subr.bf16.mxu0 %v4359_v40  ;;  %v4443_v39 = vld [vmem:[#allocation6 + $0x64] ss:$8 sps:$4 sm:$0xff]  }
 0x275   :  { %2840 = vmatpush1.bf16.msra.mxu1 %v4354_v23  ;;  %2877 = vmatpush1.bf16.msra.mxu0 %v4357_v45  ;;  %v4435_v23 = vld [vmem:[#allocation4 + $0x708] ss:$16 sps:$4 sm:$0xff]  }
 0x276   :  { %2841 = vmatprep.subr.bf16.mxu1 %v4362_v2  ;;  %2878 = vmatprep.subr.bf16.mxu0 %v4365_v41  ;;  %v4441_v45 = vld [vmem:[#allocation6 + $0x60] ss:$8 sps:$4 sm:$0xff]   ;;  %v4446_v41 = vld [vmem:[#allocation6 + $0x54] ss:$8 sps:$4 sm:$0xff]  }
 0x279   :  { %2842 = vmatpush1.bf16.msra.mxu1 %v4360_v42  ;;  %2879 = vmatpush1.bf16.msra.mxu0 %v4363_v43  ;;  %v4444_v43 = vld [vmem:[#allocation6 + $0x50] ss:$8 sps:$4 sm:$0xff]  }
 0x27a   :  { %2843 = vmatprep.subr.bf16.mxu1 %v4368_v44  ;;  %2880 = vmatprep.subr.bf16.mxu0 %v4371_v46  ;;  %v4449_v46 = vld [vmem:[#allocation6 + $0x44] ss:$8 sps:$4 sm:$0xff]  }
 0x27d   :  { %2844 = vmatpush1.bf16.msra.mxu1 %v4366_v52  ;;  %2881 = vmatpush1.bf16.msra.mxu0 %v4369_v47  ;;  %v4447_v52 = vld [vmem:[#allocation6 + $0x40] ss:$8 sps:$4 sm:$0xff]  }
 0x27e   :  { %2845 = vmatprep.subr.bf16.mxu1 %v4374_v49  ;;  %2882 = vmatprep.subr.bf16.mxu0 %v4377_v29  ;;  %v4452_v49 = vld [vmem:[#allocation6 + $0x34] ss:$8 sps:$4 sm:$0xff]  }
 0x281   :  { %2846 = vmatpush1.bf16.msra.mxu1 %v4372_v50  ;;  %2883 = vmatpush1.bf16.msra.mxu0 %v4375_v54  ;;  %v4450_v50 = vld [vmem:[#allocation6 + $0x30] ss:$8 sps:$4 sm:$0xff]  }
 0x282   :  { %2847 = vmatprep.subr.bf16.mxu1 %v4380_v55  ;;  %2884 = vmatprep.subr.bf16.mxu0 %v4383_v57  ;;  %v4455_v55 = vld [vmem:[#allocation6 + $0x24] ss:$8 sps:$4 sm:$0xff]   ;;  %v4486_v57 = vld [vmem:[#allocation6 + $0x170] ss:$8 sps:$4 sm:$0xff]  }
 0x285   :  { %2848 = vmatpush1.bf16.msra.mxu1 %v4378_v59  ;;  %2885 = vmatpush1.bf16.msra.mxu0 %v4381_v60  ;;  %v4488_v59 = vld [vmem:[#allocation6 + $0x174] ss:$8 sps:$4 sm:$0xff]   ;;  %v4491_v60 = vld [vmem:[#allocation6 + $0x164] ss:$8 sps:$4 sm:$0xff]  }
 0x286   :  { %2849 = vmatprep.subr.bf16.mxu1 %v4386_v61  ;;  %2886 = vmatprep.subr.bf16.mxu0 %v4389_v62  ;;  %v4489_v61 = vld [vmem:[#allocation6 + $0x160] ss:$8 sps:$4 sm:$0xff]   ;;  %v4458_v62 = vld [vmem:[#allocation6 + $0x14] ss:$8 sps:$4 sm:$0xff]  }
 0x289   :  { %2850 = vmatpush2.bf16.msra.mxu1 %v4384_v63  ;;  %2887 = vmatpush1.bf16.msra.mxu0 %v4387_v0  ;;  %v4494_v63 = vld [vmem:[#allocation6 + $0x154] ss:$8 sps:$4 sm:$0xff]   ;;  %v4456_v0 = vld [vmem:[#allocation6 + $0x10] ss:$8 sps:$4 sm:$0xff]  }
 0x28a   :  { %2851 = vmatprep.subr.bf16.mxu1 %v4392_v12  ;;  %2888 = vmatprep.subr.bf16.mxu0 %v4395_v5  ;;  %v4492_v12 = vld [vmem:[#allocation6 + $0x150] ss:$8 sps:$4 sm:$0xff]   ;;  %v4461_v5 = vld [vmem:[#allocation6 + $0x4] ss:$8 sps:$4 sm:$0xff]  }
 0x28d   :  { %2852 = vmatpush2.bf16.msra.mxu1 %v4390_v6  ;;  %2889 = vmatpush1.bf16.msra.mxu0 %v4393_v53  ;;  %v4497_v6 = vld [vmem:[#allocation6 + $0x144] ss:$8 sps:$4 sm:$0xff]   ;;  %v4459_v53 = vld [vmem:[#allocation6] ss:$8 sps:$4 sm:$0xff]  }
 0x28e   :  { %2853 = vmatprep.subr.bf16.mxu1 %v4398_v8  ;;  %2890 = vmatprep.subr.bf16.mxu0 %v4401_v9  ;;  %v4495_v8 = vld [vmem:[#allocation6 + $0x140] ss:$8 sps:$4 sm:$0xff]   ;;  %v4464_v9 = vld [vmem:[#allocation6 + $0xf4] ss:$8 sps:$4 sm:$0xff]  }
 0x291   :  { %2854 = vmatpush2.bf16.msra.mxu1 %v4396_v10  ;;  %2891 = vmatpush2.bf16.msra.mxu0 %v4399_v11  ;;  %v4500_v10 = vld [vmem:[#allocation6 + $0x134] ss:$8 sps:$4 sm:$0xff]   ;;  %v4462_v11 = vld [vmem:[#allocation6 + $0xf0] ss:$8 sps:$4 sm:$0xff]  }
 0x292   :  { %2855 = vmatprep.subr.bf16.mxu1 %v4404_v13  ;;  %2892 = vmatprep.subr.bf16.mxu0 %v4407_v14  ;;  %v4498_v13 = vld [vmem:[#allocation6 + $0x130] ss:$8 sps:$4 sm:$0xff]   ;;  %v4467_v14 = vld [vmem:[#allocation6 + $0xe4] ss:$8 sps:$4 sm:$0xff]  }
 0x295   :  { %2856 = vmatpush2.bf16.msra.mxu1 %v4402_v15  ;;  %2893 = vmatpush2.bf16.msra.mxu0 %v4405_v16  ;;  %v4503_v15 = vld [vmem:[#allocation6 + $0x124] ss:$8 sps:$4 sm:$0xff]   ;;  %v4465_v16 = vld [vmem:[#allocation6 + $0xe0] ss:$8 sps:$4 sm:$0xff]  }
 0x296   :  { %2857 = vmatprep.subr.bf16.mxu1 %v4410_v19  ;;  %2894 = vmatprep.subr.bf16.mxu0 %v4413_v1  ;;  %v4501_v19 = vld [vmem:[#allocation6 + $0x120] ss:$8 sps:$4 sm:$0xff]   ;;  %v4470_v1 = vld [vmem:[#allocation6 + $0xd4] ss:$8 sps:$4 sm:$0xff]  }
 0x299   :  { %2858 = vmatpush2.bf16.msra.mxu1 %v4408_v22  ;;  %2895 = vmatpush2.bf16.msra.mxu0 %v4411_v51  ;;  %v4506_v22 = vld [vmem:[#allocation6 + $0x114] ss:$8 sps:$4 sm:$0xff]   ;;  %v4468_v51 = vld [vmem:[#allocation6 + $0xd0] ss:$8 sps:$4 sm:$0xff]  }
 0x29a   :  { %2859 = vmatprep.subr.bf16.mxu1 %v4416_v58  ;;  %2896 = vmatprep.subr.bf16.mxu0 %v4419_v24  ;;  %v4504_v58 = vld [vmem:[#allocation6 + $0x110] ss:$8 sps:$4 sm:$0xff]   ;;  %v4473_v24 = vld [vmem:[#allocation6 + $0xc4] ss:$8 sps:$4 sm:$0xff]  }
 0x29d   :  { %2860 = vmatpush2.bf16.msra.mxu1 %v4414_v25  ;;  %2897 = vmatpush2.bf16.msra.mxu0 %v4417_v26  ;;  %v4509_v25 = vld [vmem:[#allocation6 + $0x104] ss:$8 sps:$4 sm:$0xff]   ;;  %v4471_v26 = vld [vmem:[#allocation6 + $0xc0] ss:$8 sps:$4 sm:$0xff]  }
 0x29e   :  { %2861 = vmatprep.subr.bf16.mxu1 %v4422_v27  ;;  %2898 = vmatprep.subr.bf16.mxu0 %v4425_v56  ;;  %v4507_v27 = vld [vmem:[#allocation6 + $0x100] ss:$8 sps:$4 sm:$0xff]   ;;  %v4476_v56 = vld [vmem:[#allocation6 + $0xb4] ss:$8 sps:$4 sm:$0xff]  }
 0x2a1   :  { %2862 = vmatpush2.bf16.msra.mxu1 %v4420_v30  ;;  %2899 = vmatpush2.bf16.msra.mxu0 %v4423_v31  ;;  %v4512_v30 = vld [vmem:[#allocation6 + $0x1f4] ss:$8 sps:$4 sm:$0xff]   ;;  %v4474_v31 = vld [vmem:[#allocation6 + $0xb0] ss:$8 sps:$4 sm:$0xff]  }
 0x2a2   :  { %2863 = vmatprep.subr.bf16.mxu1 %v4428_v17  ;;  %2900 = vmatprep.subr.bf16.mxu0 %v4431_v28  ;;  %v4510_v17 = vld [vmem:[#allocation6 + $0x1f0] ss:$8 sps:$4 sm:$0xff]   ;;  %v4479_v28 = vld [vmem:[#allocation6 + $0xa4] ss:$8 sps:$4 sm:$0xff]  }
 0x2a5   :  { %2864 = vmatpush2.bf16.msra.mxu1 %v4426_v32  ;;  %2901 = vmatpush2.bf16.msra.mxu0 %v4429_v33  ;;  %v4515_v32 = vld [vmem:[#allocation6 + $0x1e4] ss:$8 sps:$4 sm:$0xff]   ;;  %v4477_v33 = vld [vmem:[#allocation6 + $0xa0] ss:$8 sps:$4 sm:$0xff]  }
 0x2a6   :  { %2902 = vmatprep.subr.bf16.mxu0 %v4434_v34  ;;  %3319 = vmatprep.subr.bf16.mxu1 %v4440_v35  ;;  %v4513_v34 = vld [vmem:[#allocation6 + $0x1e0] ss:$8 sps:$4 sm:$0xff]   ;;  %v4482_v35 = vld [vmem:[#allocation6 + $0x94] ss:$8 sps:$4 sm:$0xff]  }
 0x2a8   :  { %2866 = vmatmul.mubr.bf16.vlgmr.msra.gmra.mxu1 %v4852_v20  ;;  %v4866_v40 = vpop.f32.mrf.mxu1 }
 0x2a9   :  { %2903 = vmatpush2.bf16.msra.mxu0 %v4432_v36  ;;  %3320 = vmatpush1.bf16.msra.mxu1 %v4438_v37  ;;  %v4518_v36 = vld [vmem:[#allocation6 + $0x1d4] ss:$8 sps:$4 sm:$0xff]   ;;  %v4480_v37 = vld [vmem:[#allocation6 + $0x90] ss:$8 sps:$4 sm:$0xff]  }
 0x2aa   :  { %v4868_v2 = vpop.f32.mrf.mxu1  ;;  %2904 = vmatprep.subr.bf16.mxu0 %v4437_v38  ;;  %3321 = vmatprep.subr.bf16.mxu1 %v4443_v39  ;;  %v4516_v38 = vld [vmem:[#allocation6 + $0x1d0] ss:$8 sps:$4 sm:$0xff]   ;;  %v4485_v39 = vld [vmem:[#allocation6 + $0x84] ss:$8 sps:$4 sm:$0xff]  }
 0x2ac   :  { %v2625_v42 = vpop.f32.mrf.mxu1 }
 0x2ad   :  { %2905 = vmatpush2.bf16.msra.mxu0 %v4435_v23  ;;  %3322 = vmatpush1.bf16.msra.mxu1 %v4441_v45  ;;  %v4521_v23 = vld [vmem:[#allocation6 + $0x1c4] ss:$8 sps:$4 sm:$0xff]   ;;  %v4483_v45 = vld [vmem:[#allocation6 + $0x80] ss:$8 sps:$4 sm:$0xff]  }
 0x2ae   :  { %v2626_v44 = vpop.f32.mrf.mxu1  ;;  %3323 = vmatprep.subr.bf16.mxu1 %v4446_v41  ;;  %3360 = vmatprep.subr.bf16.mxu0 %v4488_v59  ;;  %v4519_v41 = vld [vmem:[#allocation6 + $0x1c0] ss:$8 sps:$4 sm:$0xff]   ;;  %v4527_v59 = vld [vmem:[#allocation6 + $0x1a4] ss:$8 sps:$4 sm:$0xff]  }
 0x2af   :  { %v4878_v42 = vld [vmem:[%s4961_s8] sm:$0xf] }
 0x2b0   :  { %2907 = vmatmul.mubr.bf16.vlgmr.msra.gmra.mxu0 %v4857_v3  ;;  %v4871_v20 = vpop.f32.mrf.mxu0  ;;  %v4453_v3 = vld [vmem:[#allocation6 + $0x20] ss:$8 sps:$4 sm:$0xff]  }
 0x2b1   :  { %3324 = vmatpush1.bf16.msra.mxu1 %v4444_v43  ;;  %3361 = vmatpush1.bf16.msra.mxu0 %v4486_v57  ;;  %v1290_v43 = vrot.slane %v4878_v42, %v4804_v4 }
 0x2b2   :  { %v4873_v47 = vpop.f32.mrf.mxu0  ;;  %3325 = vmatprep.subr.bf16.mxu1 %v4449_v46  ;;  %3362 = vmatprep.subr.bf16.mxu0 %v4491_v60  ;;  %v1294_v46 = vrot.slane %v4878_v42, %v4807_v7 }
 0x2b4   :  { %v2666_v29 = vpop.f32.mrf.mxu0 }
 0x2b5   :  { %3326 = vmatpush1.bf16.msra.mxu1 %v4447_v52  ;;  %3363 = vmatpush1.bf16.msra.mxu0 %v4489_v61  ;;  %v4524_v52 = vld [vmem:[#allocation6 + $0x1b4] ss:$8 sps:$4 sm:$0xff]   ;;  %v4522_v29 = vld [vmem:[#allocation6 + $0x1b0] ss:$8 sps:$4 sm:$0xff]  }
 0x2b6   :  { %v2667_v54 = vpop.f32.mrf.mxu0  ;;  %3327 = vmatprep.subr.bf16.mxu1 %v4452_v49  ;;  %3364 = vmatprep.subr.bf16.mxu0 %v4494_v63 }
 0x2b9   :  { %3328 = vmatpush1.bf16.msra.mxu1 %v4450_v50  ;;  %3365 = vmatpush1.bf16.msra.mxu0 %v4492_v12  ;;  %v2622_v50 = vadd.f32 %v4866_v40, %v1290_v43 }
 0x2ba   :  { %3329 = vmatprep.subr.bf16.mxu1 %v4455_v55  ;;  %3366 = vmatprep.subr.bf16.mxu0 %v4497_v6  ;;  %v2624_v55 = vadd.f32 %v4868_v2, %v1294_v46  ;;  %v4528_v6 = vld [vmem:[#allocation6 + $0x190] ss:$8 sps:$4 sm:$0xff]  }
 0x2bb   :  { %v2663_v57 = vadd.f32 %v4871_v20, %v2622_v50 }
 0x2bc   :  { %v2665_v61 = vadd.f32 %v4873_v47, %v2624_v55 }
 0x2bd   :  { %3330 = vmatpush1.bf16.msra.mxu1 %v4453_v3  ;;  %3367 = vmatpush1.bf16.msra.mxu0 %v4495_v8  ;;  %v4525_v3 = vld [vmem:[#allocation6 + $0x1a0] ss:$8 sps:$4 sm:$0xff]  }
 0x2be   :  { %3331 = vmatprep.subr.bf16.mxu1 %v4458_v62  ;;  %3368 = vmatprep.subr.bf16.mxu0 %v4500_v10 }
 0x2c1   :  { %3332 = vmatpush1.bf16.msra.mxu1 %v4456_v0  ;;  %3369 = vmatpush1.bf16.msra.mxu0 %v4498_v13 }
 0x2c2   :  { %3333 = vmatprep.subr.bf16.mxu1 %v4461_v5  ;;  %3370 = vmatprep.subr.bf16.mxu0 %v4503_v15  ;;  %v4530_v5 = vld [vmem:[#allocation6 + $0x194] ss:$8 sps:$4 sm:$0xff]  }
 0x2c5   :  { %3334 = vmatpush1.bf16.msra.mxu1 %v4459_v53  ;;  %3371 = vmatpush1.bf16.msra.mxu0 %v4501_v19 }
 0x2c6   :  { %3335 = vmatprep.subr.bf16.mxu1 %v4464_v9  ;;  %3372 = vmatprep.subr.bf16.mxu0 %v4506_v22  ;;  %v4533_v9 = vld [vmem:[#allocation6 + $0x184] ss:$8 sps:$4 sm:$0xff]  }
 0x2c9   :  { %3336 = vmatpush2.bf16.msra.mxu1 %v4462_v11  ;;  %3373 = vmatpush1.bf16.msra.mxu0 %v4504_v58  ;;  %v4531_v11 = vld [vmem:[#allocation6 + $0x180] ss:$8 sps:$4 sm:$0xff]  }
 0x2ca   :  { %3337 = vmatprep.subr.bf16.mxu1 %v4467_v14  ;;  %3374 = vmatprep.subr.bf16.mxu0 %v4509_v25  ;;  %v4535_v25 = vld [vmem:[%s4964_s11 + $0x38] sm:$0xff]  }
 0x2cd   :  { %3338 = vmatpush2.bf16.msra.mxu1 %v4465_v16  ;;  %3375 = vmatpush1.bf16.msra.mxu0 %v4507_v27  ;;  %v4537_v27 = vld [vmem:[%s4964_s11 + $0x30] sm:$0xff]  }
 0x2ce   :  { %3339 = vmatprep.subr.bf16.mxu1 %v4470_v1  ;;  %3376 = vmatprep.subr.bf16.mxu0 %v4512_v30  ;;  %v4539_v30 = vld [vmem:[%s4964_s11 + $0x28] sm:$0xff]  }
 0x2d1   :  { %3340 = vmatpush2.bf16.msra.mxu1 %v4468_v51  ;;  %3377 = vmatpush2.bf16.msra.mxu0 %v4510_v17  ;;  %v4541_v17 = vld [vmem:[%s4964_s11 + $0x20] sm:$0xff]  }
 0x2d2   :  { %3341 = vmatprep.subr.bf16.mxu1 %v4473_v24  ;;  %3378 = vmatprep.subr.bf16.mxu0 %v4515_v32  ;;  %v4534_v24 = vld [vmem:[%s4964_s11 + $0x78] sm:$0xff]  }
 0x2d3   :  { %v4543_v32 = vld [vmem:[%s4964_s11 + $0x18] sm:$0xff]  }
 0x2d5   :  { %3342 = vmatpush2.bf16.msra.mxu1 %v4471_v26  ;;  %3379 = vmatpush2.bf16.msra.mxu0 %v4513_v34  ;;  %v4536_v26 = vld [vmem:[%s4964_s11 + $0x70] sm:$0xff]  }
 0x2d6   :  { %3343 = vmatprep.subr.bf16.mxu1 %v4476_v56  ;;  %3380 = vmatprep.subr.bf16.mxu0 %v4518_v36  ;;  %v4538_v56 = vld [vmem:[%s4964_s11 + $0x68] sm:$0xff]   ;;  %v4545_v34 = vld [vmem:[%s4964_s11 + $0x10] sm:$0xff]  }
 0x2d9   :  { %3344 = vmatpush2.bf16.msra.mxu1 %v4474_v31  ;;  %3381 = vmatpush2.bf16.msra.mxu0 %v4516_v38  ;;  %v4540_v31 = vld [vmem:[%s4964_s11 + $0x60] sm:$0xff]  }
 0x2da   :  { %3345 = vmatprep.subr.bf16.mxu1 %v4479_v28  ;;  %3382 = vmatprep.subr.bf16.mxu0 %v4521_v23  ;;  %v4542_v28 = vld [vmem:[%s4964_s11 + $0x58] sm:$0xff]  }
 0x2dd   :  { %3346 = vmatpush2.bf16.msra.mxu1 %v4477_v33  ;;  %3383 = vmatpush2.bf16.msra.mxu0 %v4519_v41  ;;  %v4544_v33 = vld [vmem:[%s4964_s11 + $0x50] sm:$0xff]  }
 0x2de   :  { %3347 = vmatprep.subr.bf16.mxu1 %v4482_v35  ;;  %3384 = vmatprep.subr.bf16.mxu0 %v4524_v52  ;;  %v1298_v35 = vrot.slane %v4878_v42, %v975_v18 }
 0x2e1   :  { %3348 = vmatpush2.bf16.msra.mxu1 %v4480_v37  ;;  %3385 = vmatpush2.bf16.msra.mxu0 %v4522_v29  ;;  %v1302_v37 = vrot.slane %v4878_v42, %v979_v21  ;;  %v4546_v42 = vld [vmem:[%s4964_s11 + $0x48] sm:$0xff]  }
 0x2e2   :  { %3349 = vmatprep.subr.bf16.mxu1 %v4485_v39  ;;  %3386 = vmatprep.subr.bf16.mxu0 %v4527_v59 }
 0x2e5   :  { %3350 = vmatpush2.bf16.msra.mxu1 %v4483_v45  ;;  %3387 = vmatpush2.bf16.msra.mxu0 %v4525_v3 }
 0x2e6   :  { %3388 = vmatprep.subr.bf16.mxu0 %v4530_v5  ;;  %4013 = vmatprep.subr.bf16.mxu1 %v4534_v24  ;;  %v2987_v5 = vld [vmem:[%s4963_s10] sm:$0x3] }
 0x2e8   :  { %v2703_v44 = vpop.f32.mrf.mxu1 }
 0x2e9   :  { %v2704_v62 = vadd.f32 %v2703_v44, %v2663_v57  ;;  %3389 = vmatpush2.bf16.msra.mxu0 %v4528_v6  ;;  %v2996_v6 = vrot.slane %v2987_v5, %v4807_v7 }
 0x2ea   :  { %v2705_v49 = vpop.f32.mrf.mxu1  ;;  %3390 = vmatprep.subr.bf16.mxu0 %v4533_v9 }
 0x2eb   :  { %v2706_v0 = vadd.f32 %v2705_v49, %v2665_v61  ;;  %v4547_v61 = vld [vmem:[%s4964_s11 + $0x8] sm:$0xff]  }
 0x2ec   :  { %v2707_v54 = vpop.f32.mrf.mxu1 }
 0x2ed   :  { %3391 = vmatpush2.bf16.msra.mxu0 %v4531_v11 }
 0x2ee   :  { %v2708_v60 = vpop.f32.mrf.mxu1 }
 0x2f0   :  { %v2744_v63 = vpop.f32.mrf.mxu0 }
 0x2f1   :  { %v2745_v12 = vadd.f32 %v2744_v63, %v2704_v62  ;;  %v4548_v63 = vld [vmem:[%s4964_s11 + $0x40] sm:$0xff]  }
 0x2f2   :  { %v2746_v40 = vpop.f32.mrf.mxu0 }
 0x2f3   :  { %v2747_v53 = vadd.f32 %v2746_v40, %v2706_v0  ;;  %v2915_v8 = vmax.f32 %v2745_v12, 0.0  ;;  %v4549_v12 = vld [vmem:[%s4964_s11] sm:$0xff]   ;;  %v2992_v40 = vrot.slane %v2987_v5, %v4804_v4 }
 0x2f4   :  { %v2748_v2 = vpop.f32.mrf.mxu0  ;;  %v3994_v4 = vld [vmem:[%s4965_s12] ss:$0 sm:$0xff] }
 0x2f5   :  { %v2916_v20 = vmax.f32 %v2747_v53, 0.0  ;;  %v2919_v47 = vpack.c.bf16 %v2915_v8, %v2915_v8 }
 0x2f6   :  { %v2749_v10 = vpop.f32.mrf.mxu0 }
 0x2f7   :  { %v2920_v13 = vpack.c.bf16 %v2916_v20, %v2916_v20 }
 0x2f9   :  { %3351 = vmatprep.mubr.bf16.mxu1 %v2920_v13 }
 0x2fa   :  { %3352 = vmatmul.mubr.bf16.vlgmr.msra.gmra.mxu1 %v2919_v47 }
 0x2fb   :  { %4014 = vmatpush3.bf16.msra.mxu1 %v4535_v25 }
 0x2fc   :  { %4015 = vmatprep.subr.bf16.mxu1 %v4536_v26 }
 0x2ff   :  { %4016 = vmatpush3.bf16.msra.mxu1 %v4537_v27 }
 0x300   :  { %4017 = vmatprep.subr.bf16.mxu1 %v4538_v56 }
 0x303   :  { %4018 = vmatpush3.bf16.msra.mxu1 %v4539_v30 }
 0x304   :  { %4019 = vmatprep.subr.bf16.mxu1 %v4540_v31 }
 0x307   :  { %4020 = vmatpush3.bf16.msra.mxu1 %v4541_v17 }
 0x308   :  { %4021 = vmatprep.subr.bf16.mxu1 %v4542_v28 }
 0x30b   :  { %4022 = vmatpush3.bf16.msra.mxu1 %v4543_v32 }
 0x30c   :  { %4023 = vmatprep.subr.bf16.mxu1 %v4544_v33 }
 0x30f   :  { %4024 = vmatpush3.bf16.msra.mxu1 %v4545_v34 }
 0x310   :  { %4025 = vmatprep.subr.bf16.mxu1 %v4546_v42 }
 0x313   :  { %4026 = vmatpush3.bf16.msra.mxu1 %v4547_v61 }
 0x314   :  { %4027 = vmatprep.subr.bf16.mxu1 %v4548_v63 }
 0x317   :  { %4028 = vmatpush3.bf16.msra.mxu1 %v4549_v12 }
 0x328   :  { %v2785_v14 = vpop.f32.mrf.mxu1 }
 0x329   :  { %v2786_v39 = vadd.f32 %v2785_v14, %v1298_v35 }
 0x32a   :  { %v2787_v15 = vpop.f32.mrf.mxu1 }
 0x32b   :  { %v2788_v45 = vadd.f32 %v2787_v15, %v1302_v37 }
 0x32c   :  { %v2789_v16 = vpop.f32.mrf.mxu1 }
 0x32e   :  { %v2790_v19 = vpop.f32.mrf.mxu1 }
 0x330   :  { %v2826_v1 = vpop.f32.mrf.mxu0 }
 0x331   :  { %v2827_v41 = vadd.f32 %v2826_v1, %v2786_v39 }
 0x332   :  { %v2828_v22 = vpop.f32.mrf.mxu0 }
 0x333   :  { %v2829_v44 = vadd.f32 %v2828_v22, %v2788_v45 }
 0x334   :  { %v2830_v51 = vpop.f32.mrf.mxu0 }
 0x336   :  { %v2831_v58 = vpop.f32.mrf.mxu0 }
 0x368   :  { %v2867_v36 = vpop.f32.mrf.mxu1 }
 0x369   :  { %v2868_v46 = vadd.f32 %v2867_v36, %v2827_v41 }
 0x36a   :  { %v2869_v38 = vpop.f32.mrf.mxu1 }
 0x36b   :  { %v2870_v49 = vadd.f32 %v2869_v38, %v2829_v44 }
 0x36c   :  { %v2871_v23 = vpop.f32.mrf.mxu1 }
 0x36e   :  { %v2872_v43 = vpop.f32.mrf.mxu1 }
 0x370   :  { %v2908_v52 = vpop.f32.mrf.mxu0 }
 0x371   :  { %v2909_v29 = vadd.f32 %v2908_v52, %v2868_v46 }
 0x372   :  { %v2910_v50 = vpop.f32.mrf.mxu0 }
 0x373   :  { %v2911_v54 = vadd.f32 %v2910_v50, %v2870_v49  ;;  %v2917_v55 = vmax.f32 %v2909_v29, 0.0 }
 0x374   :  { %v2912_v18 = vpop.f32.mrf.mxu0 }
 0x375   :  { %v2918_v57 = vmax.f32 %v2911_v54, 0.0  ;;  %v2921_v60 = vpack.c.bf16 %v2917_v55, %v2917_v55 }
 0x376   :  { %v2913_v59 = vpop.f32.mrf.mxu0 }
 0x377   :  { %v2922_v48 = vpack.c.bf16 %v2918_v57, %v2918_v57 }
 0x379   :  { %3392 = vmatprep.mubr.bf16.mxu0 %v2922_v48 }
 0x37a   :  { %3393 = vmatmul.mubr.bf16.vlgmr.msra.gmra.mxu0 %v2921_v60 }
 0x3ba   :  { %v3353_v21 = vpop.f32.mrf.mxu1 }
 0x3bb   :  { %v3354_v53 = vadd.f32 %v3353_v21, %v2992_v40 }
 0x3bc   :  { %v3355_v3 = vpop.f32.mrf.mxu1 }
 0x3bd   :  { %v3356_v2 = vadd.f32 %v3355_v3, %v2996_v6 }
 0x3be   :  { %v3357_v62 = vpop.f32.mrf.mxu1 }
 0x3c0   :  { %v3358_v0 = vpop.f32.mrf.mxu1 }
 0x43a   :  { %v3394_v8 = vpop.f32.mrf.mxu0 }
 0x43b   :  { %v3395_v20 = vadd.f32 %v3394_v8, %v3354_v53 }
 0x43c   :  { %v3396_v9 = vpop.f32.mrf.mxu0 }
 0x43d   :  { %v3397_v10 = vadd.f32 %v3396_v9, %v3356_v2  ;;  %v3401_v11 = vmax.f32 %v3395_v20, 0.0 }
 0x43e   :  { %v3398_v13 = vpop.f32.mrf.mxu0 }
 0x43f   :  { %v3402_v47 = vmax.f32 %v3397_v10, 0.0  ;;  %v3403_v16 = vpack.c.bf16 %v3401_v11, %v3401_v11 }
 0x440   :  { %v3399_v14 = vpop.f32.mrf.mxu0 }
 0x441   :  { %v3404_v15 = vpack.c.bf16 %v3402_v47, %v3402_v47 }
 0x443   :  { %3572 = vmatprep.mubr.bf16.mxu1 %v3404_v15 }
 0x444   :  { %3573 = vmatmul.mubr.bf16.vlgmr.msra.gmra.mxu1 %v3403_v16 }
 0x504   :  { %v4029_v19 = vpop.f32.mrf.mxu1 }
 0x506   :  { %v4030_v7 = vpop.f32.mrf.mxu1 }
 0x507   :  { %v4031_v1 = vadd.f32 %v4030_v7, %v4029_v19 }
 0x508   :  { %v4032_v22 = vpop.f32.mrf.mxu1 }
 0x509   :  { %v3575_v51 = vadd.f32 %v4031_v1, %v3994_v4 }
 0x50a   :  { %v4033_v58 = vpop.f32.mrf.mxu1 }
 0x50b   :  { %3580 = vst [vmem:[%s4966_s13] sm:$0xff] %v3575_v51 }
 0x50c   :  { %3585 = vsyncpa [#allocation3], 1 }
 0x50d   :  { %3586 = vsyncpa [#allocation5], 1 }

</bundles_post_ra>
